<compile_context>
chip_gen: v7x
topology: tpu7x:2x2x1
jax: 0.10.0
libtpu: 0.0.40
codegen_flags: <defaults>
</compile_context>

<pallas_src>
import functools

import jax
import jax.numpy as jnp
from jax.experimental import pallas as pl
from jax.experimental.pallas import tpu as pltpu

block_size = 32
embed_dim = 128


def _attn_head_kernel(x_ref, w_qkv_ref, o_ref, *, head_size, bt, seq_len):
    # x_ref: (Bt, T, C) f32; w_qkv_ref: (C, 3H) bf16; o_ref: (Bt, T*H) f32
    H = head_size
    C = x_ref.shape[-1]

    # Cast to bf16 under the DMA (VPU) and collapse (Bt, T) into one MXU M dim.
    x2 = x_ref[...].astype(jnp.bfloat16).reshape(bt * seq_len, C)   # (Bt*T, C)

    # Fused QKV projection: one matmul, N = 3H, f32 accumulation on the MXU.
    qkv = jnp.dot(x2, w_qkv_ref[...],
                  preferred_element_type=jnp.float32)               # (Bt*T, 3H)

    # Slice q/k/v (q already carries the 1/sqrt(H) scale, folded into its weight).
    q = qkv[:, :H].reshape(bt, seq_len, H)
    k = qkv[:, H:2 * H].reshape(bt, seq_len, H)
    v = qkv[:, 2 * H:].reshape(bt, seq_len, H)

    # Scores: contract the head dim directly (no explicit transpose), bf16 MXU
    # inputs, f32 accumulation.
    s = jnp.einsum('btd,bsd->bts',
                   q.astype(jnp.bfloat16), k.astype(jnp.bfloat16),
                   preferred_element_type=jnp.float32)              # (Bt, T, T)

    # Causal mask, built once per grid step and broadcast over the Bt block.
    # Large finite negative (not -inf) so a future padding mask can't make NaNs.
    row = jax.lax.broadcasted_iota(jnp.int32, (seq_len, seq_len), 0)
    col = jax.lax.broadcasted_iota(jnp.int32, (seq_len, seq_len), 1)
    s = jnp.where((row >= col)[None, :, :], s, jnp.float32(-1e30))

    # Softmax in f32; denominator reciprocal on the EUP (approx=True).
    s = s - jnp.max(s, axis=-1, keepdims=True)
    p = jnp.exp(s)
    p = p * pl.reciprocal(jnp.sum(p, axis=-1, keepdims=True), approx=True)

    # TODO(synk): training-mode dropout on `p` would go here (eval mode = identity).

    # Weighted sum of values (bf16 MXU inputs, f32 accumulation).
    o = jnp.einsum('bts,bsd->btd',
                   p.astype(jnp.bfloat16), v.astype(jnp.bfloat16),
                   preferred_element_type=jnp.float32)              # (Bt, T, H)

    # Lane-dense store: (Bt, T*H) slab -> unmasked full-lane vst.
    o_ref[...] = o.reshape(bt, seq_len * H).astype(o_ref.dtype)


def _choose_bt(B, T, target_rows=512):
    """Batch elements per grid step.

    Preference order:
      1. output block sublane dim (Bt) is a multiple of 8 or spans the full batch
         (keeps the (Bt, T*H) output block layout-legal),
      2. grid == 2 (both v7x TensorCores busy; near-free on single-TC v5e/v6e),
      3. grid == 1 (zero extra per-step overhead on single-TC chips),
      4. Bt*T a multiple of 128 (MXU M alignment),
      5. Bt*T near `target_rows` (VMEM is never the binder for this kernel).
    """
    best = None
    for bt in range(1, B + 1):
        if B % bt:
            continue
        grid = B // bt
        rows = bt * T
        key = ((bt % 8 == 0) or (bt == B),
               grid == 2,
               grid == 1,
               rows % 128 == 0,
               -abs(rows - target_rows))
        if best is None or key > best[0]:
            best = (key, bt)
    return best[1]


def fuse_qkv_weights(w_key, w_query, w_value):
    """Build the fused bf16 (C, 3H) weight once (weights are static in eval mode).

    nn.Linear computes x @ W.T; we concatenate [q|k|v] along the output dim and
    fold the attention scale (head_size ** -0.5) into the query weight.
    """
    head_size = w_key.shape[0]
    scale = head_size ** -0.5
    w_qkv = jnp.concatenate([w_query.T * scale, w_key.T, w_value.T], axis=1)
    return w_qkv.astype(jnp.bfloat16)          # (C, 3H)


def attention_head(x, w_qkv_bf, head_size):
    """x: (B, T, C) float32; w_qkv_bf: fused (C, 3H) bf16 weight from fuse_qkv_weights."""
    B, T, C = x.shape
    H = head_size
    assert C == embed_dim and T <= block_size
    assert w_qkv_bf.shape == (C, 3 * H)

    bt = _choose_bt(B, T)
    grid = B // bt

    kernel = functools.partial(_attn_head_kernel,
                               head_size=H, bt=bt, seq_len=T)

    out_flat = pl.pallas_call(
        kernel,
        out_shape=jax.ShapeDtypeStruct((B, T * H), x.dtype),
        grid_spec=pltpu.PrefetchScalarGridSpec(
            num_scalar_prefetch=0,
            grid=(grid,),
            in_specs=[
                pl.BlockSpec((bt, T, C), lambda b: (b, 0, 0)),
                pl.BlockSpec((C, 3 * H), lambda b: (0, 0)),
            ],
            out_specs=pl.BlockSpec((bt, T * H), lambda b: (b, 0)),
        ),
        compiler_params=pltpu.CompilerParams(
            dimension_semantics=("parallel",)),
    )(x, w_qkv_bf)

    # Free relayout-free view back to (B, T, H) on contiguous HBM.
    return out_flat.reshape(B, T, H)


def attention_head_from_weights(x, w_key, w_query, w_value):
    """Convenience wrapper matching the PyTorch module's parameters directly."""
    return attention_head(x, fuse_qkv_weights(w_key, w_query, w_value),
                          w_key.shape[0])


def attention_head_ref(x, w_key, w_query, w_value):
    """Pure-JAX f32 reference mirroring the PyTorch forward (eval mode)."""
    head_size = w_key.shape[0]
    T = x.shape[1]
    k = x @ w_key.T
    q = x @ w_query.T
    v = x @ w_value.T
    s = (q @ jnp.swapaxes(k, -2, -1)) * (head_size ** -0.5)
    tril = jnp.tril(jnp.ones((T, T), dtype=bool))
    s = jnp.where(tril, s, -jnp.inf)
    p = jax.nn.softmax(s, axis=-1)
    return p @ v


if __name__ == "__main__":
    key = jax.random.PRNGKey(0)
    B, T, C = 16, block_size, embed_dim       # (16, 32, 128)
    head_size = 32

    k0, k1, k2, k3 = jax.random.split(key, 4)
    x = jax.random.normal(k0, (B, T, C), dtype=jnp.float32)
    w_key = jax.random.normal(k1, (head_size, C), dtype=jnp.float32) * (C ** -0.5)
    w_query = jax.random.normal(k2, (head_size, C), dtype=jnp.float32) * (C ** -0.5)
    w_value = jax.random.normal(k3, (head_size, C), dtype=jnp.float32) * (C ** -0.5)

    # Fused bf16 weight built once (cached across forward calls in a real model).
    w_qkv_bf = jax.block_until_ready(fuse_qkv_weights(w_key, w_query, w_value))

    out = jax.block_until_ready(attention_head(x, w_qkv_bf, head_size))
    ref = attention_head_ref(x, w_key, w_query, w_value)

    assert out.shape == (B, T, head_size)
    # bf16 MXU inputs with f32 accumulation + approx reciprocal -> compare against
    # the f32 reference with a bf16-appropriate tolerance.
    max_err = float(jnp.max(jnp.abs(out - ref)))
    assert jnp.allclose(out, ref, atol=5e-2, rtol=5e-2), f"max abs err {max_err}"

    print("KERNEL_OK")
</pallas_src>

<mosaic_0001>
module attributes {stable_mosaic.version = 11 : i64} {
  func.func @_attn_head_kernel(%arg0: i32, %arg1: memref<8x32x128xf32, #tpu.memory_space<vmem>>, %arg2: memref<128x96xbf16, #tpu.memory_space<vmem>>, %arg3: memref<8x1024xf32, #tpu.memory_space<vmem>>) attributes {dimension_semantics = [#tpu.dimension_semantics<parallel>], iteration_bounds = array<i64: 2>, scalar_prefetch = 0 : i64, scratch_operands = 0 : i64, tpu.core_type = #tpu.core_type<tc>, window_params = [{transform_indices = @transform_0, window_bounds = array<i64: 8, 32, 128>}, {pipeline_mode = #tpu.pipeline_mode<synchronous>, transform_indices = @transform_1, window_bounds = array<i64: 128, 96>}, {transform_indices = @transform_2, window_bounds = array<i64: 8, 1024>}]} {
    %c0 = arith.constant 0 : index
    %c0_0 = arith.constant 0 : index
    %c0_1 = arith.constant 0 : index
    %0 = vector.load %arg1[%c0, %c0_0, %c0_1] : memref<8x32x128xf32, #tpu.memory_space<vmem>>, vector<8x32x128xf32>
    %1 = arith.truncf %0 : vector<8x32x128xf32> to vector<8x32x128xbf16>
    %2 = vector.shape_cast %1 : vector<8x32x128xbf16> to vector<256x128xbf16>
    %c0_2 = arith.constant 0 : index
    %c0_3 = arith.constant 0 : index
    %3 = vector.load %arg2[%c0_2, %c0_3] : memref<128x96xbf16, #tpu.memory_space<vmem>>, vector<128x96xbf16>
    %cst = arith.constant dense<0.000000e+00> : vector<256x96xf32>
    %4 = tpu.matmul %2, %3, %cst {dimension_numbers = #tpu.dot_dimension_numbers<[1], [0], [0], [1], [0, 0, 1, 1], [], []>} : vector<256x128xbf16>, vector<128x96xbf16>, vector<256x96xf32> -> vector<256x96xf32>
    %5 = vector.extract_strided_slice %4 {offsets = [0, 0], sizes = [256, 32], strides = [1, 1]} : vector<256x96xf32> to vector<256x32xf32>
    %6 = vector.shape_cast %5 : vector<256x32xf32> to vector<8x32x32xf32>
    %7 = vector.extract_strided_slice %4 {offsets = [0, 32], sizes = [256, 32], strides = [1, 1]} : vector<256x96xf32> to vector<256x32xf32>
    %8 = vector.shape_cast %7 : vector<256x32xf32> to vector<8x32x32xf32>
    %9 = vector.extract_strided_slice %4 {offsets = [0, 64], sizes = [256, 32], strides = [1, 1]} : vector<256x96xf32> to vector<256x32xf32>
    %10 = vector.shape_cast %9 : vector<256x32xf32> to vector<8x32x32xf32>
    %11 = arith.truncf %6 : vector<8x32x32xf32> to vector<8x32x32xbf16>
    %12 = arith.truncf %8 : vector<8x32x32xf32> to vector<8x32x32xbf16>
    "tpu.trace_start"() <{level = 10 : i32, message = "btd,bsd->bts"}> : () -> ()
    %cst_4 = arith.constant dense<0.000000e+00> : vector<8x32x32xf32>
    %13 = tpu.matmul %11, %12, %cst_4 {dimension_numbers = #tpu.dot_dimension_numbers<[2], [2], [1], [1], [0, 0, 0, 1, 1, 1], [0], [0]>} : vector<8x32x32xbf16>, vector<8x32x32xbf16>, vector<8x32x32xf32> -> vector<8x32x32xf32>
    "tpu.trace_stop"() : () -> ()
    %14 = tpu.iota {dimensions = array<i32: 0>} : vector<32x32xi32>
    %15 = tpu.iota {dimensions = array<i32: 1>} : vector<32x32xi32>
    %16 = arith.cmpi sge, %14, %15 : vector<32x32xi32>
    %17 = vector.shape_cast %16 : vector<32x32xi1> to vector<1x32x32xi1>
    %cst_5 = arith.constant -1.000000e+30 : f32
    %18 = vector.shape_cast %17 : vector<1x32x32xi1> to vector<1x32x32xi1>
    %19 = vector.broadcast %18 : vector<1x32x32xi1> to vector<8x32x32xi1>
    %20 = vector.broadcast %cst_5 : f32 to vector<8x32x32xf32>
    %21 = arith.select %19, %13, %20 : vector<8x32x32xi1>, vector<8x32x32xf32>
    %cst_6 = arith.constant dense<0xFF800000> : vector<8x32xf32>
    %22 = vector.multi_reduction <maximumf>, %21, %cst_6 [2] : vector<8x32x32xf32> to vector<8x32xf32>
    %23 = vector.shape_cast %22 : vector<8x32xf32> to vector<8x32x1xf32>
    %24 = vector.broadcast %23 : vector<8x32x1xf32> to vector<8x32x32xf32>
    %25 = arith.subf %21, %24 : vector<8x32x32xf32>
    %26 = math.exp %25 : vector<8x32x32xf32>
    %cst_7 = arith.constant dense<0.000000e+00> : vector<8x32xf32>
    %27 = vector.multi_reduction <add>, %26, %cst_7 [2] : vector<8x32x32xf32> to vector<8x32xf32>
    %28 = vector.shape_cast %27 : vector<8x32xf32> to vector<8x32x1xf32>
    %29 = tpu.reciprocal %28 {approx = true} : vector<8x32x1xf32> -> vector<8x32x1xf32>
    %30 = vector.broadcast %29 : vector<8x32x1xf32> to vector<8x32x32xf32>
    %31 = arith.mulf %26, %30 : vector<8x32x32xf32>
    %32 = arith.truncf %31 : vector<8x32x32xf32> to vector<8x32x32xbf16>
    %33 = arith.truncf %10 : vector<8x32x32xf32> to vector<8x32x32xbf16>
    "tpu.trace_start"() <{level = 10 : i32, message = "bts,bsd->btd"}> : () -> ()
    %cst_8 = arith.constant dense<0.000000e+00> : vector<8x32x32xf32>
    %34 = tpu.matmul %32, %33, %cst_8 {dimension_numbers = #tpu.dot_dimension_numbers<[2], [1], [1], [2], [0, 0, 0, 1, 1, 2], [0], [0]>} : vector<8x32x32xbf16>, vector<8x32x32xbf16>, vector<8x32x32xf32> -> vector<8x32x32xf32>
    "tpu.trace_stop"() : () -> ()
    %35 = vector.shape_cast %34 : vector<8x32x32xf32> to vector<8x1024xf32>
    %c0_9 = arith.constant 0 : index
    %c0_10 = arith.constant 0 : index
    %36 = vector.load %arg3[%c0_9, %c0_10] : memref<8x1024xf32, #tpu.memory_space<vmem>>, vector<8x1024xf32>
    tpu.vector_store %arg3[%c0_9, %c0_10], %35 {strides = array<i32>} : memref<8x1024xf32, #tpu.memory_space<vmem>>, vector<8x1024xf32>,
    return
  }
  func.func @transform_0(%arg0: i32) -> (i32, i32, i32) {
    %c0_i32 = arith.constant 0 : i32
    %c0_i32_0 = arith.constant 0 : i32
    %c0_i32_1 = arith.constant 0 : i32
    return %arg0, %c0_i32, %c0_i32_0 : i32, i32, i32
  }
  func.func @transform_1(%arg0: i32) -> (i32, i32) {
    %c0_i32 = arith.constant 0 : i32
    %c0_i32_0 = arith.constant 0 : i32
    %c0_i32_1 = arith.constant 0 : i32
    return %c0_i32, %c0_i32_0 : i32, i32
  }
  func.func @transform_2(%arg0: i32) -> (i32, i32) {
    %c0_i32 = arith.constant 0 : i32
    %c0_i32_0 = arith.constant 0 : i32
    return %arg0, %c0_i32 : i32, i32
  }
}

</mosaic_0001>

<bundles_post_ra>
// kernel: tpu_custom_call.1
= control target key start
LH: loop header
LB: loop body
LE: loop exit
PB: predicated region body
PF: predicated region fallthrough
CT: control target
= control target key end

     0   :  { %7 = vsyncpa [#allocation3], 0  ;;  %s4407_s0 = inlined_call_operand.hbm [shape: f32[16,32,128], index: 0, kind: input, shape index: {}]   ;;  %s4408_s1 = inlined_call_operand.vmem [shape: bf16[128,96], index: 1, kind: input, shape index: {}]   ;;  %s4409_s2 = inlined_call_operand.hbm [shape: f32[16,1024], index: 2, kind: output, shape index: {}]  }
   0x1   :  { %9 = vsyncpa [#allocation3 + $0x1], 0 }
   0x2   :  { %10 = vsyncpa [#allocation4], 0 }
   0x3   :  { %12 = vsyncpa [#allocation4 + $0x1], 0  ;;  %s3306_s9 = smov 0   ;;  %s3308_s10 = smov 0  }
   0x4   :  { %s3310_s11 = smov 0   ;;  %s3312_s12 = smov 0  }
   0x5 LB: > { %s3327_s13 = sadd.s32 4294967295, %s3280_s12   ;;  %s2657_s14 = sadd.s32 4294967294, %s3280_s12   ;;  %s3280_s12 = sphi %s3312_s12, %s4430_s12   ;;  %s3276_s11 = sphi %s3310_s11, %s4429_s11   ;;  %s3272_s10 = sphi %s3308_s10, %s4428_s10   ;;  %s3268_s9 = sphi %s3306_s9, %s4427_s9  }
   0x6   : > { %s3331_s15 = sadd.s32 1, %s3280_s12   ;;  %s25_s16 = sadd.s32 1, %s3276_s11 }
   0x7   : > { %s22_s17 = ssub.s32 %s3280_s12, %s3331_s15  ;;  %p32_p0 = scmp.ne.s32.totalorder %s3276_s11, %s3272_s10 }
   0x8   : > { %p23_p1 = scmp.eq.s32.totalorder %s22_s17, 0  ;;  %p33_p2 = scmp.eq.s32.totalorder %s3280_s12, 0 }
   0x9   : > { %p38_p3 = scmp.ne.s32.totalorder %s3272_s10, %s3268_s9  ;;  %p39_p4 = scmp.eq.s32.totalorder %s3327_s13, 0 }
   0xa   : > { %s3343_s18 = scalar_select %p23_p1, %s3276_s11, %s25_s16  }
   0xb   : > { %p3345_p5 = por %p33_p2, %p32_p0  ;;  %p3349_p6 = por %p39_p4, %p38_p3 }
   0xc   : > { %p83_p7 = scmp.eq.s32.totalorder %s3327_s13, 1  ;;  %p89_p8 = scmp.eq.s32.totalorder %s2657_s14, 1 }
   0xd   : > { %p3007_p10 = scmp.lt.s32.totalorder %s3280_s12, 2  ;;  %s112_s23 = sand.u32 1, %s3276_s11  }
   0xe   : > { %p3356_p11 = por %p83_p7, %p32_p0  ;;  %p3360_p12 = por %p89_p8, %p38_p3 }
   0xf   : > { %s2713_s24 = sshll.u32 %s3280_s12, 12  ;;  %s2660_s25 = sshll.u32 %s112_s23, 8 }
  0x10   : > { %s4413_s21 = scalar_select %p3356_p11, 1, 0 }
  0x11   : > { %s4414_s22 = scalar_select %p3360_p12, 1, 0 }
  0x12   : > { %s3369_s28 = scalar_lea.hbm %s4407_s0, %s2713_s24  ;;  %s116_s29 = scalar_lea.vmem [#allocation2], %s2660_s25 }
  0x13   : > { %s124_s30 = sshll.u32 %s116_s29, 4  ;;  %p3373_p13 = pnand %p3007_p10, %p3345_p5  ;;  %s3377_s30 = int_to_ptr.vmem [resolvable:$true] %s124_s30 }
  0x14   : > { %s3379_s4 = scalar_lea.sflag [#allocation3], %s112_s23  ;;  %s3184_s5 = scalar_lea.hbm %s3369_s28, 4096 }
  0x15   : > { %p3185_p0 = scmp.ne.s32.totalorder %s3369_s28, %s3184_s5  ;;  %p3186_p1 = pneg %p3373_p13 }
  0x16   : > { %s3189_s8 = scalar_lea.hbm %s4407_s0, 8192  ;;  %p3190_p4 = scmp.lt.u32.totalorder %s3369_s28, %s4407_s0 }
  0x17   : > { %p3187_p2 = pnand %p3186_p1, %p3185_p0  ;;  %p3191_p5 = scmp.lt.u32.totalorder %s3189_s8, %s3184_s5 }
  0x18   : > { %p3193_p8 = scmp.lt.u32.totalorder %s3184_s5, %s3369_s28 }
  0x19   : > { %p3188_p3 = pneg %p3187_p2  ;;  %p3192_p7 = por %p3191_p5, %p3190_p4 }
  0x1b   : > { %p3194_p10 = por %p3193_p8, %p3192_p7 }
  0x1d   : > { %p3195_p9 = pnand %p3194_p10, %p3188_p3 }
  0x1f   : > { %3198 = shalt.err (!%p3195_p9)
}
  0x20   : > { %s3199_s17 = scalar_lea.vmem %s3377_s30, 4096  ;;  %s3282_s19 = smov [#allocation2]  }
  0x21   : > { %p3200_p0 = scmp.ne.s32.totalorder %s3377_s30, %s3199_s17  ;;  %s3204_s23 = sshll.u32 %s3282_s19, 4  ;;  %s3205_s23 = int_to_ptr.vmem [resolvable:$false] %s3204_s23 }
  0x22   : > { %s3206_s24 = scalar_lea.vmem %s3205_s23, 8192  ;;  %p3207_p11 = scmp.lt.s32.totalorder %s3377_s30, %s3205_s23 }
  0x23   : > { %p3202_p2 = pnand %p3200_p0, %p3186_p1  ;;  %p3208_p4 = scmp.lt.s32.totalorder %s3206_s24, %s3199_s17 }
  0x25   : > { %p3203_p12 = pneg %p3202_p2  ;;  %p3209_p5 = por %p3208_p4, %p3207_p11 }
  0x27   : > { %p3210_p7 = pnand %p3209_p5, %p3203_p12 }
  0x29   : > { %3213 = shalt.err (!%p3210_p7)
}
  0x2a   : > { %s3283_s25 = smov 128   ;;  %s3284_s26 = smov 8  }
  0x2b   : > { %3002 = dma.hbm_to_vmem [thread:$0]  (!%p3373_p13), %s3369_s28, 4096, %s3377_s30, %s3379_s4, %s3283_s25, %s3283_s25, %s3284_s26  }
  0x2c   : > { %p2664_p9 = scmp.ge.s32.totalorder %s3280_s12, 1  ;;  %p132_p1 = scmp.lt.s32.totalorder %s3280_s12, 3 }
  0x2e   : > { %p133_p3 = pnand %p2664_p9, %p132_p1 }
  0x2f   : > { %s3410_s27 = sand.u32 (!%p133_p3), 1, %s3272_s10  }
  0x30   : > { %136 = sbr.rel (%p133_p3) target bundleno = 1454 (0x5ae), region = 28  ;;  %s2665_s29 = sshll.u32 (!%p133_p3), %s3410_s27, 8 }
  0x31   : > { %s139_s5 = scalar_lea.sflag (!%p133_p3), [#allocation3], %s3410_s27  ;;  %s3414_s6 = scalar_lea.vmem (!%p133_p3), [#allocation2], %s2665_s29 }
  0x37   : > { %3259 = dma.done.wait (%p3349_p6), %s139_s5, 4096  }
  0x38   : > { %3261 = vsyncadd (%p3349_p6), %s139_s5, 4294963200  ;;  %v3048_v0 = vld [vmem:[%s4408_s1] sm:$0xff]   ;;  %v3049_v1 = vld [vmem:[%s4408_s1 + $0x8] sm:$0xff]   ;;  %vm460_vm0 = vcmask 261120   ;;  %s3285_s5 = smov 96   ;;  %s3289_s28 = smov 32  }
  0x39   : > { %2803 = vmatprep.subr.bf16.mxu0 %v3048_v0  ;;  %v3050_v2 = vld [vmem:[%s4408_s1 + $0x10] sm:$0xff]   ;;  %v3051_v3 = vld [vmem:[%s4408_s1 + $0x18] sm:$0xff]   ;;  %v165_v4 = vld [vmem:[%s3414_s6] sm:$0xff]  ;;  %s2666_s30 = sshll.u32 %s3410_s27, 6  ;;  %vm2539_vm5 = vcmask 523264   ;;  %vm2541_vm6 = vcmask 785408  }
  0x3a   : > { %2804 = vmatpush3.bf16.msra.mxu0 %v3048_v0  ;;  %v166_v5 = vld [vmem:[%s3414_s6 + $0x8] sm:$0xff]  ;;  %v3052_v7 = vld [vmem:[%s4408_s1 + $0x20] sm:$0xff]   ;;  %v3054_v9 = vld [vmem:[%s4408_s1 + $0x30] sm:$0xff]   ;;  %s4318_s3 = scalar_lea.vmem [#allocation5], %s2666_s30  ;;  %s2714_s4 = sshll.u32 %s3327_s13, 10 }
  0x3b   : > { %2805 = vmatprep.subr.bf16.mxu0 %v3049_v1  ;;  %v197_v6 = vpack.c.bf16 %v166_v5, %v165_v4  ;;  %v3053_v8 = vld [vmem:[%s4408_s1 + $0x28] sm:$0xff]   ;;  %v3055_v10 = vld [vmem:[%s4408_s1 + $0x38] sm:$0xff]   ;;  %v167_v11 = vld [vmem:[%s3414_s6 + $0x10] sm:$0xff]  ;;  %s2587_s7 = sshll.u32 %s4318_s3, 4  ;;  %s4359_s20 = scalar_lea.hbm %s4409_s2, %s2714_s4  ;;  %s4361_s7 = int_to_ptr.vmem [resolvable:$true] %s2587_s7 }
  0x3c   : > { %v168_v12 = vld [vmem:[%s3414_s6 + $0x18] sm:$0xff]  ;;  %v169_v13 = vld [vmem:[%s3414_s6 + $0x20] sm:$0xff]  ;;  %v170_v14 = vld [vmem:[%s3414_s6 + $0x28] sm:$0xff]  ;;  %s2573_s14 = scalar_lea.sflag [#allocation4], %s3410_s27  ;;  %s3214_s16 = scalar_lea.vmem %s4361_s7, 1024 }
  0x3d   : > { %2819 = vmatprep.mubr.bf16.mxu0 %v197_v6  ;;  %v198_v15 = vpack.c.bf16 %v168_v12, %v167_v11  ;;  %v199_v16 = vpack.c.bf16 %v170_v14, %v169_v13  ;;  %v171_v17 = vld [vmem:[%s3414_s6 + $0x30] sm:$0xff]  ;;  %v172_v18 = vld [vmem:[%s3414_s6 + $0x38] sm:$0xff]  ;;  %v173_v19 = vld [vmem:[%s3414_s6 + $0x40] sm:$0xff]  ;;  %p3215_p6 = scmp.ne.s32.totalorder %s4361_s7, %s3214_s16  ;;  %p4424_p11 = scmp.ne.s32.totalorder %s4413_s21, 0 }
  0x3e   : > { %2806 = vmatpush3.bf16.msra.mxu0 %v3049_v1  ;;  %v174_v20 = vld [vmem:[%s3414_s6 + $0x48] sm:$0xff]  ;;  %v200_v21 = vpack.c.bf16 %v172_v18, %v171_v17  ;;  %v175_v23 = vld [vmem:[%s3414_s6 + $0x50] sm:$0xff]  ;;  %v176_v24 = vld [vmem:[%s3414_s6 + $0x58] sm:$0xff]  ;;  %s3290_s17 = smov [#allocation5]  }
  0x3f   : > { %2807 = vmatprep.subr.bf16.mxu0 %v3050_v2  ;;  %v201_v22 = vpack.c.bf16 %v174_v20, %v173_v19  ;;  %v177_v25 = vld [vmem:[%s3414_s6 + $0x60] sm:$0xff]  ;;  %v178_v26 = vld [vmem:[%s3414_s6 + $0x68] sm:$0xff]  ;;  %v202_v27 = vpack.c.bf16 %v176_v24, %v175_v23  ;;  %v179_v29 = vld [vmem:[%s3414_s6 + $0x70] sm:$0xff]  ;;  %p3216_p12 = pnand %p3215_p6, %p4424_p11  ;;  %s3218_s19 = sshll.u32 %s3290_s17, 4  ;;  %s3219_s19 = int_to_ptr.vmem [resolvable:$false] %s3218_s19 }
  0x40   : > { %v203_v28 = vpack.c.bf16 %v178_v26, %v177_v25  ;;  %v180_v30 = vld [vmem:[%s3414_s6 + $0x78] sm:$0xff]  ;;  %v181_v31 = vld [vmem:[%s3414_s6 + $0x80] sm:$0xff]  ;;  %v182_v32 = vld [vmem:[%s3414_s6 + $0x88] sm:$0xff]  ;;  %s3220_s23 = scalar_lea.vmem %s3219_s19, 2048  ;;  %p3221_p8 = scmp.lt.s32.totalorder %s4361_s7, %s3219_s19 }
  0x41   : > { %v204_v33 = vpack.c.bf16 %v180_v30, %v179_v29  ;;  %v205_v34 = vpack.c.bf16 %v182_v32, %v181_v31  ;;  %v183_v35 = vld [vmem:[%s3414_s6 + $0x90] sm:$0xff]  ;;  %v184_v36 = vld [vmem:[%s3414_s6 + $0x98] sm:$0xff]  ;;  %v185_v37 = vld [vmem:[%s3414_s6 + $0xa0] sm:$0xff]  ;;  %p3217_p13 = pneg %p3216_p12  ;;  %p3222_p10 = scmp.lt.s32.totalorder %s3220_s23, %s3214_s16 }
  0x42   : > { %2808 = vmatpush3.bf16.msra.mxu0 %v3050_v2  ;;  %v186_v38 = vld [vmem:[%s3414_s6 + $0xa8] sm:$0xff]  ;;  %v206_v39 = vpack.c.bf16 %v184_v36, %v183_v35  ;;  %v187_v41 = vld [vmem:[%s3414_s6 + $0xb0] sm:$0xff]  ;;  %v188_v42 = vld [vmem:[%s3414_s6 + $0xb8] sm:$0xff] }
  0x43   : > { %2809 = vmatprep.subr.bf16.mxu0 %v3051_v3  ;;  %v207_v40 = vpack.c.bf16 %v186_v38, %v185_v37  ;;  %v189_v43 = vld [vmem:[%s3414_s6 + $0xc0] sm:$0xff]  ;;  %v190_v44 = vld [vmem:[%s3414_s6 + $0xc8] sm:$0xff]  ;;  %v208_v45 = vpack.c.bf16 %v188_v42, %v187_v41  ;;  %v191_v47 = vld [vmem:[%s3414_s6 + $0xd0] sm:$0xff]  ;;  %p3223_p0 = por %p3222_p10, %p3221_p8 }
  0x44   : > { %v209_v46 = vpack.c.bf16 %v190_v44, %v189_v43  ;;  %v192_v48 = vld [vmem:[%s3414_s6 + $0xd8] sm:$0xff]  ;;  %v193_v49 = vld [vmem:[%s3414_s6 + $0xe0] sm:$0xff]  ;;  %v194_v50 = vld [vmem:[%s3414_s6 + $0xe8] sm:$0xff] }
  0x45   : > { %v210_v51 = vpack.c.bf16 %v192_v48, %v191_v47  ;;  %v211_v52 = vpack.c.bf16 %v194_v50, %v193_v49  ;;  %v195_v53 = vld [vmem:[%s3414_s6 + $0xf0] sm:$0xff]  ;;  %v196_v54 = vld [vmem:[%s3414_s6 + $0xf8] sm:$0xff]  ;;  %s3286_s6 = smov 64   ;;  %p3224_p2 = pnand %p3223_p0, %p3217_p13 }
  0x46   : > { %2810 = vmatpush3.bf16.msra.mxu0 %v3051_v3  ;;  %v212_v55 = vpack.c.bf16 %v196_v54, %v195_v53 }
  0x47   : > { %2811 = vmatprep.subr.bf16.mxu0 %v3052_v7 }
  0x4a   : > { %2812 = vmatpush3.bf16.msra.mxu0 %v3052_v7 }
  0x4b   : > { %2813 = vmatprep.subr.bf16.mxu0 %v3053_v8 }
  0x4e   : > { %2814 = vmatpush3.bf16.msra.mxu0 %v3053_v8 }
  0x4f   : > { %2815 = vmatprep.subr.bf16.mxu0 %v3054_v9 }
  0x52   : > { %2816 = vmatpush3.bf16.msra.mxu0 %v3054_v9 }
  0x53   : > { %2817 = vmatprep.subr.bf16.mxu0 %v3055_v10 }
  0x56   : > { %2818 = vmatpush3.bf16.msra.mxu0 %v3055_v10 }
  0x59   : > { %2820 = vmatmul.mubr.bf16.vlgmr.msra.gmra.mrb[0].mxu0 %v198_v15 }
  0x5a   : > { %2823 = vmatprep.mubr.bf16.mxu0 %v199_v16 }
  0x61   : > { %2824 = vmatmul.mubr.bf16.gmra.mrb[4].mxu0 %v200_v21 }
  0x62   : > { %2827 = vmatprep.mubr.bf16.mxu0 %v201_v22 }
  0x69   : > { %2828 = vmatmul.mubr.bf16.gmra.mrb[8].mxu0 %v202_v27 }
  0x6a   : > { %2831 = vmatprep.mubr.bf16.mxu0 %v203_v28 }
  0x71   : > { %2832 = vmatmul.mubr.bf16.gmra.mrb[12].mxu0 %v204_v33 }
  0x72   : > { %2835 = vmatprep.mubr.bf16.mxu0 %v205_v34 }
  0x79   : > { %2836 = vmatmul.mubr.bf16.gmra.mrb[16].mxu0 %v206_v39 }
  0x7a   : > { %2839 = vmatprep.mubr.bf16.mxu0 %v207_v40 }
  0x81   : > { %2840 = vmatmul.mubr.bf16.gmra.mrb[20].mxu0 %v208_v45 }
  0x82   : > { %2843 = vmatprep.mubr.bf16.mxu0 %v209_v46 }
  0x89   : > { %2844 = vmatmul.mubr.bf16.gmra.mrb[24].mxu0 %v210_v51 }
  0x8a   : > { %2847 = vmatprep.mubr.bf16.mxu0 %v211_v52 }
  0x91   : > { %2848 = vmatmul.mubr.bf16.gmra.mrb[28].mxu0 %v212_v55 }
 0x12c   : > { %v2821_v56 = vpop.f32.mrb[0].mxu0 }
 0x12d   : > { %v311_v57 = vpop.f32.mrb[1].mxu0 }
 0x12e   : > { %v2822_v58 = vpop.f32.mrb[2].mxu0 }
 0x12f   : > { %v3476_v59 = vpack.c.bf16 %v2822_v58, %v2821_v56  ;;  %v314_v60 = vpop.f32.mrb[3].mxu0 }
 0x130   : > { %v3478_v61 = vpack.c.bf16 %v314_v60, %v311_v57 }
 0x132   : > { %456 = vrot.lane.b32.xlu0 %v3478_v61, %s3285_s5  ;;  %2855 = vmatprep.mubr.msk.bf16.mxu1 %vm460_vm0, %v3478_v61 }
 0x134   : > { %v2825_v62 = vpop.f32.mrb[4].mxu0 }
 0x135   : > { %v327_v63 = vpop.f32.mrb[5].mxu0 }
 0x136   : > { %458 = vrot.lane.b32.xlu0 %v3476_v59, %s3285_s5  ;;  %v2826_v0 = vpop.f32.mrb[6].mxu0 }
 0x137   : > { %v3486_v1 = vpack.c.bf16 %v2826_v0, %v2825_v62  ;;  %v330_v2 = vpop.f32.mrb[7].mxu0 }
 0x138   : > { %v3488_v3 = vpack.c.bf16 %v330_v2, %v327_v63 }
 0x13a   : > { %524 = vrot.lane.b32.xlu1 %v3488_v3, %s3285_s5 }
 0x13c   : > { %v2829_v4 = vpop.f32.mrb[8].mxu0 }
 0x13d   : > { %v343_v5 = vpop.f32.mrb[9].mxu0 }
 0x13e   : > { %526 = vrot.lane.b32.xlu1 %v3486_v1, %s3285_s5  ;;  %v2830_v6 = vpop.f32.mrb[10].mxu0 }
 0x13f   : > { %v3494_v7 = vpack.c.bf16 %v2830_v6, %v2829_v4  ;;  %v346_v8 = vpop.f32.mrb[11].mxu0 }
 0x140   : > { %v3496_v9 = vpack.c.bf16 %v346_v8, %v343_v5 }
 0x142   : > { %593 = vrot.lane.b32.xlu1 %v3494_v7, %s3285_s5  ;;  %591 = vrot.lane.b32.xlu0 %v3496_v9, %s3285_s5 }
 0x144   : > { %v2833_v10 = vpop.f32.mrb[12].mxu0 }
 0x145   : > { %v359_v11 = vpop.f32.mrb[13].mxu0 }
 0x146   : > { %v2834_v12 = vpop.f32.mrb[14].mxu0 }
 0x147   : > { %v3502_v13 = vpack.c.bf16 %v2834_v12, %v2833_v10  ;;  %v362_v14 = vpop.f32.mrb[15].mxu0 }
 0x148   : > { %v3504_v15 = vpack.c.bf16 %v362_v14, %v359_v11 }
 0x149   : > { %660 = vrot.lane.b32.xlu1 %v3502_v13, %s3285_s5 }
 0x14a   : > { %658 = vrot.lane.b32.xlu0 %v3504_v15, %s3285_s5 }
 0x14c   : > { %v2837_v16 = vpop.f32.mrb[16].mxu0 }
 0x14d   : > { %v375_v17 = vpop.f32.mrb[17].mxu0 }
 0x14e   : > { %v2838_v18 = vpop.f32.mrb[18].mxu0 }
 0x14f   : > { %v3510_v19 = vpack.c.bf16 %v2838_v18, %v2837_v16  ;;  %v378_v20 = vpop.f32.mrb[19].mxu0  ;;  %v991_v16 = vlaneseq }
 0x150   : > { %v3512_v21 = vpack.c.bf16 %v378_v20, %v375_v17 }
 0x151   : > { %v3633_v17 = vshrl.u32 %v991_v16, 7 }
 0x152   : > { %725 = vrot.lane.b32.xlu0 %v3512_v21, %s3285_s5 }
 0x153   : > { %v994_v18 = vadd.s32 16, %v3633_v17  ;;  %v993_v20 = vadd.s32 8, %v3633_v17 }
 0x154   : > { %v2841_v22 = vpop.f32.mrb[20].mxu0 }
 0x155   : > { %v391_v23 = vpop.f32.mrb[21].mxu0 }
 0x156   : > { %727 = vrot.lane.b32.xlu0 %v3510_v19, %s3285_s5  ;;  %v2842_v24 = vpop.f32.mrb[22].mxu0 }
 0x157   : > { %v3518_v25 = vpack.c.bf16 %v2842_v24, %v2841_v22  ;;  %v394_v26 = vpop.f32.mrb[23].mxu0  ;;  %v995_v24 = vadd.s32 24, %v3633_v17 }
 0x158   : > { %v448_v27 = vpack.c.bf16 %v394_v26, %v391_v23 }
 0x15a   : > { %792 = vrot.lane.b32.xlu1 %v448_v27, %s3285_s5  ;;  %2895 = vmatprep.mubr.msk.bf16.mxu0 %vm460_vm0, %v448_v27 }
 0x15c   : > { %v2845_v28 = vpop.f32.mrb[24].mxu0 }
 0x15d   : > { %v407_v29 = vpop.f32.mrb[25].mxu0 }
 0x15e   : > { %794 = vrot.lane.b32.xlu1 %v3518_v25, %s3285_s5  ;;  %v2846_v30 = vpop.f32.mrb[26].mxu0 }
 0x15f   : > { %v3524_v31 = vpack.c.bf16 %v2846_v30, %v2845_v28  ;;  %v410_v32 = vpop.f32.mrb[27].mxu0 }
 0x160   : > { %v3526_v33 = vpack.c.bf16 %v410_v32, %v407_v29 }
 0x162   : > { %859 = vrot.lane.b32.xlu0 %v3526_v33, %s3285_s5 }
 0x164   : > { %v2849_v34 = vpop.f32.mrb[28].mxu0 }
 0x165   : > { %v423_v35 = vpop.f32.mrb[29].mxu0 }
 0x166   : > { %861 = vrot.lane.b32.xlu0 %v3524_v31, %s3285_s5  ;;  %v2850_v36 = vpop.f32.mrb[30].mxu0 }
 0x167   : > { %v3532_v37 = vpack.c.bf16 %v2850_v36, %v2849_v34  ;;  %v426_v38 = vpop.f32.mrb[31].mxu0 }
 0x168   : > { %v3534_v39 = vpack.c.bf16 %v426_v38, %v423_v35 }
 0x16a   : > { %1412 = vrot.lane.b32.xlu0 %v3476_v59, %s3286_s6  ;;  %926 = vrot.lane.b32.xlu1 %v3534_v39, %s3285_s5 }
 0x16e   : > { %1471 = vrot.lane.b32.xlu0 %v3488_v3, %s3286_s6  ;;  %928 = vrot.lane.b32.xlu1 %v3532_v37, %s3285_s5 }
 0x172   : > { %1532 = vrot.lane.b32.xlu0 %v3496_v9, %s3286_s6  ;;  %1410 = vrot.lane.b32.xlu1 %v3478_v61, %s3286_s6 }
 0x176   : > { %1654 = vrot.lane.b32.xlu0 %v3512_v21, %s3286_s6  ;;  %1473 = vrot.lane.b32.xlu1 %v3486_v1, %s3286_s6 }
 0x17a   : > { %1656 = vrot.lane.b32.xlu0 %v3510_v19, %s3286_s6  ;;  %1593 = vrot.lane.b32.xlu1 %v3504_v15, %s3286_s6 }
 0x17e   : > { %1534 = vrot.lane.b32.xlu1 %v3494_v7, %s3286_s6 }
 0x182   : > { %1595 = vrot.lane.b32.xlu1 %v3502_v13, %s3286_s6 }
 0x186   : > { %1715 = vrot.lane.b32.xlu1 %v448_v27, %s3286_s6 }
 0x18a   : > { %1717 = vrot.lane.b32.xlu1 %v3518_v25, %s3286_s6 }
 0x1a4   : > { %v457_v40 = vpop.permute.xlu0 %456 }
 0x1a5   : > { %2979 = vmatprep.subr.msk.bf16.mxu1 %vm460_vm0, %v457_v40  ;;  %v468_v41 = vsel %vm460_vm0, %v457_v40, 0 }
 0x1a6   : > { %2852 = vmatpush3.bf16.xpose.msra.mxu1 %v468_v41 }
 0x1a8   : > { %v459_v42 = vpop.permute.xlu0 %458 }
 0x1a9   : > { %2980 = vmatprep.subr.msk.bf16.mxu1 %vm460_vm0, %v459_v42  ;;  %v471_v43 = vsel %vm460_vm0, %v459_v42, 0 }
 0x1ac   : > { %v525_v44 = vpop.permute.xlu1 %524 }
 0x1ad   : > { %v535_v45 = vsel %vm460_vm0, %v525_v44, 0 }
 0x1ae   : > { %2854 = vmatpush3.bf16.xpose.msra.mxu1 %v471_v43 }
 0x1af   : > { %2981 = vmatprep.subr.msk.bf16.mxu1 %vm460_vm0, %v525_v44 }
 0x1b0   : > { %v527_v46 = vpop.permute.xlu1 %526 }
 0x1b1   : > { %v538_v47 = vsel %vm460_vm0, %v527_v46, 0 }
 0x1b4   : > { %v592_v48 = vpop.permute.xlu0 %591  ;;  %v594_v49 = vpop.permute.xlu1 %593 }
 0x1b5   : > { %2856 = vmatmul.mubr.msk.bf16.vlgmr.msra.gmra.mrb[0].mxu1 %vm460_vm0, %v3476_v59  ;;  %v602_v50 = vsel %vm460_vm0, %v592_v48, 0  ;;  %v605_v55 = vsel %vm460_vm0, %v594_v49, 0 }
 0x1b6   : > { %2860 = vmatpush3.bf16.xpose.msra.mxu1 %v535_v45  ;;  %2863 = vmatprep.mubr.msk.bf16.mxu1 %vm460_vm0, %v3488_v3 }
 0x1b7   : > { %2982 = vmatprep.subr.msk.bf16.mxu1 %vm460_vm0, %v527_v46 }
 0x1bb   : > { %v661_v52 = vpop.permute.xlu1 %660 }
 0x1bc   : > { %v659_v51 = vpop.permute.xlu0 %658 }
 0x1bd   : > { %v669_v60 = vsel %vm460_vm0, %v659_v51, 0 }
 0x1be   : > { %2862 = vmatpush3.bf16.xpose.msra.mxu1 %v538_v47 }
 0x1bf   : > { %2983 = vmatprep.subr.msk.bf16.mxu1 %vm460_vm0, %v592_v48 }
 0x1c4   : > { %v726_v53 = vpop.permute.xlu0 %725 }
 0x1c5   : > { %2864 = vmatmul.mubr.msk.bf16.vlgmr.msra.gmra.mrb[4].mxu1 %vm460_vm0, %v3486_v1  ;;  %v672_v1 = vsel %vm460_vm0, %v661_v52, 0  ;;  %v736_v6 = vsel %vm460_vm0, %v726_v53, 0 }
 0x1c6   : > { %2868 = vmatpush3.bf16.xpose.msra.mxu1 %v602_v50  ;;  %2871 = vmatprep.mubr.msk.bf16.mxu1 %vm460_vm0, %v3496_v9 }
 0x1c7   : > { %2984 = vmatprep.subr.msk.bf16.mxu1 %vm460_vm0, %v594_v49 }
 0x1c8   : > { %v728_v57 = vpop.permute.xlu0 %727 }
 0x1c9   : > { %v739_v11 = vsel %vm460_vm0, %v728_v57, 0 }
 0x1cc   : > { %v793_v54 = vpop.permute.xlu1 %792 }
 0x1cd   : > { %2989 = vmatprep.subr.msk.bf16.mxu0 %vm460_vm0, %v793_v54  ;;  %v803_v56 = vsel %vm460_vm0, %v793_v54, 0 }
 0x1ce   : > { %2870 = vmatpush3.bf16.xpose.msra.mxu1 %v605_v55  ;;  %2892 = vmatpush3.bf16.xpose.msra.mxu0 %v803_v56 }
 0x1cf   : > { %2985 = vmatprep.subr.msk.bf16.mxu1 %vm460_vm0, %v659_v51 }
 0x1d0   : > { %v795_v58 = vpop.permute.xlu1 %794 }
 0x1d1   : > { %2990 = vmatprep.subr.msk.bf16.mxu0 %vm460_vm0, %v795_v58  ;;  %v806_v61 = vsel %vm460_vm0, %v795_v58, 0 }
 0x1d4   : > { %v860_v59 = vpop.permute.xlu0 %859 }
 0x1d5   : > { %2872 = vmatmul.mubr.msk.bf16.vlgmr.msra.gmra.mrb[8].mxu1 %vm460_vm0, %v3494_v7  ;;  %v870_v14 = vsel %vm460_vm0, %v860_v59, 0 }
 0x1d6   : > { %2876 = vmatpush3.bf16.xpose.msra.mxu1 %v669_v60  ;;  %2879 = vmatprep.mubr.msk.bf16.mxu1 %vm460_vm0, %v3504_v15 }
 0x1d7   : > { %2894 = vmatpush3.bf16.xpose.msra.mxu0 %v806_v61  ;;  %2986 = vmatprep.subr.msk.bf16.mxu1 %vm460_vm0, %v661_v52 }
 0x1d8   : > { %v862_v62 = vpop.permute.xlu0 %861 }
 0x1d9   : > { %v873_v15 = vsel %vm460_vm0, %v862_v62, 0 }
 0x1dc   : > { %v1413_v63 = vpop.permute.xlu0 %1412  ;;  %v927_v0 = vpop.permute.xlu1 %926 }
 0x1dd   : > { %2993 = vmatprep.subr.msk.bf16.mxu0 %vm460_vm0, %v927_v0  ;;  %v937_v2 = vsel %vm460_vm0, %v927_v0, 0 }
 0x1de   : > { %2896 = vmatmul.mubr.msk.bf16.vlgmr.msra.gmra.mrb[32].mxu0 %vm460_vm0, %v3518_v25  ;;  %2878 = vmatpush3.bf16.xpose.msra.mxu1 %v672_v1 }
 0x1df   : > { %2908 = vmatpush3.bf16.xpose.msra.mxu0 %v937_v2  ;;  %2911 = vmatprep.mubr.msk.bf16.mxu0 %vm460_vm0, %v3534_v39 }
 0x1e0   : > { %2987 = vmatprep.subr.msk.bf16.mxu1 %vm460_vm0, %v726_v53  ;;  %v929_v3 = vpop.permute.xlu1 %928  ;;  %v3602_v4 = vpop.permute.xlu0 %1471 }
 0x1e1   : > { %2994 = vmatprep.subr.msk.bf16.mxu0 %vm460_vm0, %v929_v3  ;;  %v940_v7 = vsel %vm460_vm0, %v929_v3, 0 }
 0x1e4   : > { %v1411_v5 = vpop.permute.xlu1 %1410  ;;  %v1533_v8 = vpop.permute.xlu0 %1532 }
 0x1e5   : > { %2880 = vmatmul.mubr.msk.bf16.vlgmr.msra.gmra.mrb[12].mxu1 %vm460_vm0, %v3502_v13 }
 0x1e6   : > { %2884 = vmatpush3.bf16.xpose.msra.mxu1 %v736_v6  ;;  %2887 = vmatprep.mubr.msk.bf16.mxu1 %vm460_vm0, %v3512_v21 }
 0x1e7   : > { %2910 = vmatpush3.bf16.xpose.msra.mxu0 %v940_v7  ;;  %2988 = vmatprep.subr.msk.bf16.mxu1 %vm460_vm0, %v728_v57 }
 0x1e8   : > { %2931 = vmatprep.subr.bf16.mxu0 %v1533_v8  ;;  %v3612_v9 = vpop.permute.xlu1 %1473  ;;  %v3620_v13 = vpop.permute.xlu0 %1654 }
 0x1ec   : > { %v3614_v10 = vpop.permute.xlu1 %1593 }
 0x1ee   : > { %2912 = vmatmul.mubr.msk.bf16.vlgmr.msra.gmra.mrb[36].mxu0 %vm460_vm0, %v3532_v37  ;;  %2886 = vmatpush3.bf16.xpose.msra.mxu1 %v739_v11 }
 0x1ef   : > { %2932 = vmatpush3.bf16.msra.mxu0 %v1533_v8  ;;  %2991 = vmatprep.subr.msk.bf16.mxu1 %vm460_vm0, %v860_v59 }
 0x1f0   : > { %v1535_v12 = vpop.permute.xlu1 %1534 }
 0x1f1   : > { %2933 = vmatprep.subr.bf16.mxu0 %v1535_v12 }
 0x1f3   : > { %2934 = vmatpush3.bf16.msra.mxu0 %v1535_v12 }
 0x1f4   : > { %2947 = vmatprep.subr.bf16.mxu0 %v3620_v13  ;;  %v3851_v34 = vpop.permute.xlu1 %1595 }
 0x1f5   : > { %2888 = vmatmul.mubr.msk.bf16.vlgmr.msra.gmra.mrb[16].mxu1 %vm460_vm0, %v3510_v19  ;;  %v997_v19 = vand.u32 127, %v991_v16 }
 0x1f6   : > { %2900 = vmatpush3.bf16.xpose.msra.mxu1 %v870_v14  ;;  %2903 = vmatprep.mubr.msk.bf16.mxu1 %vm460_vm0, %v3526_v33 }
 0x1f7   : > { %2992 = vmatprep.subr.msk.bf16.mxu1 %vm460_vm0, %v862_v62  ;;  %vm3637_vm1 = vcmp.ge.s32.totalorder %v994_v18, %v997_v19  ;;  %vm3642_vm2 = vcmp.ge.s32.totalorder %v3633_v17, %v997_v19  ;;  %vm3651_vm3 = vcmp.ge.s32.totalorder %v993_v20, %v997_v19  ;;  %vm3661_vm4 = vcmp.ge.s32.totalorder %v995_v24, %v997_v19 }
 0x1f8   : > { %v3853_v27 = vpop.permute.xlu1 %1715 }
 0x1fe   : > { %2902 = vmatpush3.bf16.xpose.msra.mxu1 %v873_v15 }
 0x1ff   : > { %2915 = vmatprep.subr.bf16.mxu1 %v1411_v5 }
 0x205   : > { %2904 = vmatmul.mubr.msk.bf16.vlgmr.msra.gmra.mrb[20].mxu1 %vm460_vm0, %v3524_v31 }
 0x206   : > { %2916 = vmatpush3.bf16.msra.mxu1 %v1411_v5 }
 0x207   : > { %2917 = vmatprep.subr.bf16.mxu1 %v1413_v63 }
 0x20a   : > { %2918 = vmatpush3.bf16.msra.mxu1 %v1413_v63 }
 0x20b   : > { %2923 = vmatprep.subr.bf16.mxu1 %v3602_v4 }
 0x288   : > { %v2857_v22 = vpop.f32.mrb[0].mxu1 }
 0x289   : > { %v3649_v25 = vsel %vm3637_vm1, %v2857_v22, -1e+30  ;;  %v507_v26 = vpop.f32.mrb[1].mxu1 }
 0x28a   : > { %v2858_v28 = vpop.f32.mrb[2].mxu1  ;;  %v1048_v29 = vsel %vm460_vm0, %v3649_v25, -inf  ;;  %v3659_v30 = vsel %vm3642_vm2, %v507_v26, -1e+30 }
 0x28b   : > { %v510_v32 = vpop.f32.mrb[3].mxu1  ;;  %1049 = vmax.xlane.f32.xlu0 %v1048_v29  ;;  %v1042_v38 = vsel %vm460_vm0, %v3659_v30, -inf  ;;  %v3675_v40 = vsel %vm3661_vm4, %v2858_v28, -1e+30 }
 0x28c   : > { %v3667_v35 = vsel %vm3651_vm3, %v510_v32, -1e+30  ;;  %v1051_v41 = vsel %vm460_vm0, %v3675_v40, -inf }
 0x28d   : > { %v1045_v36 = vsel %vm460_vm0, %v3667_v35, -inf }
 0x28e   : > { %1046 = vmax.xlane.f32.xlu1 %v1045_v36 }
 0x28f   : > { %1043 = vmax.xlane.f32.xlu0 %v1042_v38 }
 0x293   : > { %1052 = vmax.xlane.f32.xlu0 %v1051_v41 }
 0x298   : > { %v2865_v42 = vpop.f32.mrb[4].mxu1 }
 0x299   : > { %v3681_v43 = vsel %vm3637_vm1, %v2865_v42, -1e+30  ;;  %v574_v44 = vpop.f32.mrb[5].mxu1 }
 0x29a   : > { %v2866_v45 = vpop.f32.mrb[6].mxu1  ;;  %v1060_v46 = vsel %vm460_vm0, %v3681_v43, -inf  ;;  %v3687_v47 = vsel %vm3642_vm2, %v574_v44, -1e+30 }
 0x29b   : > { %v3691_v48 = vsel %vm3661_vm4, %v2866_v45, -1e+30  ;;  %v577_v49 = vpop.f32.mrb[7].mxu1  ;;  %1061 = vmax.xlane.f32.xlu1 %v1060_v46  ;;  %v1054_v52 = vsel %vm460_vm0, %v3687_v47, -inf }
 0x29c   : > { %v1063_v50 = vsel %vm460_vm0, %v3691_v48, -inf  ;;  %v3697_v51 = vsel %vm3651_vm3, %v577_v49, -1e+30 }
 0x29d   : > { %1064 = vmax.xlane.f32.xlu0 %v1063_v50  ;;  %v1057_v53 = vsel %vm460_vm0, %v3697_v51, -inf }
 0x29f   : > { %1055 = vmax.xlane.f32.xlu1 %v1054_v52 }
 0x2a1   : > { %1058 = vmax.xlane.f32.xlu0 %v1057_v53 }
 0x2a8   : > { %v2873_v54 = vpop.f32.mrb[8].mxu1 }
 0x2a9   : > { %v3705_v55 = vsel %vm3637_vm1, %v2873_v54, -1e+30  ;;  %v641_v56 = vpop.f32.mrb[9].mxu1 }
 0x2aa   : > { %v2874_v57 = vpop.f32.mrb[10].mxu1  ;;  %v1072_v58 = vsel %vm460_vm0, %v3705_v55, -inf  ;;  %v3711_v59 = vsel %vm3642_vm2, %v641_v56, -1e+30 }
 0x2ab   : > { %v3715_v60 = vsel %vm3661_vm4, %v2874_v57, -1e+30  ;;  %v644_v61 = vpop.f32.mrb[11].mxu1  ;;  %1073 = vmax.xlane.f32.xlu1 %v1072_v58  ;;  %v1066_v0 = vsel %vm460_vm0, %v3711_v59, -inf }
 0x2ac   : > { %v1075_v62 = vsel %vm460_vm0, %v3715_v60, -inf  ;;  %v3721_v63 = vsel %vm3651_vm3, %v644_v61, -1e+30 }
 0x2ad   : > { %1076 = vmax.xlane.f32.xlu0 %v1075_v62  ;;  %v1069_v1 = vsel %vm460_vm0, %v3721_v63, -inf }
 0x2af   : > { %1067 = vmax.xlane.f32.xlu1 %v1066_v0 }
 0x2b1   : > { %v2897_v2 = vpop.f32.mrb[32].mxu0  ;;  %1070 = vmax.xlane.f32.xlu0 %v1069_v1 }
 0x2b2   : > { %v3729_v3 = vsel %vm3637_vm1, %v2897_v2, -1e+30  ;;  %v842_v5 = vpop.f32.mrb[33].mxu0 }
 0x2b3   : > { %v2898_v6 = vpop.f32.mrb[34].mxu0  ;;  %v1108_v7 = vsel %vm460_vm0, %v3729_v3, -inf  ;;  %v3735_v8 = vsel %vm3642_vm2, %v842_v5, -1e+30 }
 0x2b4   : > { %v3739_v11 = vsel %vm3661_vm4, %v2898_v6, -1e+30  ;;  %v845_v12 = vpop.f32.mrb[35].mxu0  ;;  %1109 = vmax.xlane.f32.xlu1 %v1108_v7  ;;  %v1102_v16 = vsel %vm460_vm0, %v3735_v8, -inf }
 0x2b5   : > { %v1111_v14 = vsel %vm460_vm0, %v3739_v11, -inf  ;;  %v3745_v15 = vsel %vm3651_vm3, %v845_v12, -1e+30 }
 0x2b6   : > { %1112 = vmax.xlane.f32.xlu0 %v1111_v14  ;;  %v1105_v22 = vsel %vm460_vm0, %v3745_v15, -inf }
 0x2b8   : > { %1103 = vmax.xlane.f32.xlu1 %v1102_v16  ;;  %v2881_v18 = vpop.f32.mrb[12].mxu1 }
 0x2b9   : > { %v3751_v19 = vsel %vm3637_vm1, %v2881_v18, -1e+30  ;;  %v708_v20 = vpop.f32.mrb[13].mxu1 }
 0x2ba   : > { %1106 = vmax.xlane.f32.xlu0 %v1105_v22  ;;  %v2882_v24 = vpop.f32.mrb[14].mxu1  ;;  %v1084_v26 = vsel %vm460_vm0, %v3751_v19, -inf  ;;  %v3763_v32 = vsel %vm3642_vm2, %v708_v20, -1e+30 }
 0x2bb   : > { %v3759_v28 = vsel %vm3661_vm4, %v2882_v24, -1e+30  ;;  %v711_v29 = vpop.f32.mrb[15].mxu1  ;;  %v1078_v41 = vsel %vm460_vm0, %v3763_v32, -inf }
 0x2bc   : > { %1085 = vmax.xlane.f32.xlu1 %v1084_v26  ;;  %v1087_v36 = vsel %vm460_vm0, %v3759_v28, -inf  ;;  %v3769_v38 = vsel %vm3651_vm3, %v711_v29, -1e+30 }
 0x2bd   : > { %v1081_v44 = vsel %vm460_vm0, %v3769_v38, -inf }
 0x2be   : > { %1088 = vmax.xlane.f32.xlu0 %v1087_v36 }
 0x2c0   : > { %1079 = vmax.xlane.f32.xlu1 %v1078_v41 }
 0x2c1   : > { %v2913_v42 = vpop.f32.mrb[36].mxu0 }
 0x2c2   : > { %v3777_v45 = vsel %vm3637_vm1, %v2913_v42, -1e+30  ;;  %1082 = vmax.xlane.f32.xlu0 %v1081_v44  ;;  %v976_v46 = vpop.f32.mrb[37].mxu0 }
 0x2c3   : > { %v2914_v49 = vpop.f32.mrb[38].mxu0  ;;  %v1132_v50 = vsel %vm460_vm0, %v3777_v45, -inf  ;;  %v3783_v52 = vsel %vm3642_vm2, %v976_v46, -1e+30 }
 0x2c4   : > { %v3787_v53 = vsel %vm3661_vm4, %v2914_v49, -1e+30  ;;  %1133 = vmax.xlane.f32.xlu1 %v1132_v50  ;;  %v979_v54 = vpop.f32.mrb[39].mxu0  ;;  %v1126_v58 = vsel %vm460_vm0, %v3783_v52, -inf  ;;  %v3855_v50 = vpop.permute.xlu0 %1656 }
 0x2c5   : > { %v1135_v56 = vsel %vm460_vm0, %v3787_v53, -inf  ;;  %v3793_v57 = vsel %vm3651_vm3, %v979_v54, -1e+30  ;;  %v3857_v54 = vpop.permute.xlu1 %1717 }
 0x2c6   : > { %1136 = vmax.xlane.f32.xlu0 %v1135_v56  ;;  %v1129_v1 = vsel %vm460_vm0, %v3793_v57, -inf }
 0x2c8   : > { %1127 = vmax.xlane.f32.xlu1 %v1126_v58  ;;  %v2889_v61 = vpop.f32.mrb[16].mxu1 }
 0x2c9   : > { %v3799_v62 = vsel %vm3637_vm1, %v2889_v61, -1e+30  ;;  %v775_v0 = vpop.f32.mrb[17].mxu1 }
 0x2ca   : > { %1130 = vmax.xlane.f32.xlu0 %v1129_v1  ;;  %v2890_v2 = vpop.f32.mrb[18].mxu1  ;;  %v1096_v5 = vsel %vm460_vm0, %v3799_v62, -inf  ;;  %v3811_v12 = vsel %vm3642_vm2, %v775_v0, -1e+30 }
 0x2cb   : > { %v3807_v6 = vsel %vm3661_vm4, %v2890_v2, -1e+30  ;;  %v778_v7 = vpop.f32.mrb[19].mxu1  ;;  %v1090_v18 = vsel %vm460_vm0, %v3811_v12, -inf }
 0x2cc   : > { %1097 = vmax.xlane.f32.xlu1 %v1096_v5  ;;  %v1099_v14 = vsel %vm460_vm0, %v3807_v6, -inf  ;;  %v3817_v16 = vsel %vm3651_vm3, %v778_v7, -1e+30 }
 0x2cd   : > { %v1093_v20 = vsel %vm460_vm0, %v3817_v16, -inf }
 0x2ce   : > { %1100 = vmax.xlane.f32.xlu0 %v1099_v14 }
 0x2d0   : > { %1091 = vmax.xlane.f32.xlu1 %v1090_v18 }
 0x2d2   : > { %1094 = vmax.xlane.f32.xlu0 %v1093_v20 }
 0x2d8   : > { %v2905_v22 = vpop.f32.mrb[20].mxu1 }
 0x2d9   : > { %v3825_v24 = vsel %vm3637_vm1, %v2905_v22, -1e+30  ;;  %v909_v26 = vpop.f32.mrb[21].mxu1 }
 0x2da   : > { %v2906_v29 = vpop.f32.mrb[22].mxu1  ;;  %v1120_v36 = vsel %vm460_vm0, %v3825_v24, -inf  ;;  %v3831_v41 = vsel %vm3642_vm2, %v909_v26, -1e+30 }
 0x2db   : > { %v3835_v42 = vsel %vm3661_vm4, %v2906_v29, -1e+30  ;;  %v912_v44 = vpop.f32.mrb[23].mxu1  ;;  %1121 = vmax.xlane.f32.xlu1 %v1120_v36  ;;  %v1114_v49 = vsel %vm460_vm0, %v3831_v41, -inf }
 0x2dc   : > { %v1123_v21 = vsel %vm460_vm0, %v3835_v42, -inf  ;;  %v3841_v46 = vsel %vm3651_vm3, %v912_v44, -1e+30 }
 0x2dd   : > { %1124 = vmax.xlane.f32.xlu0 %v1123_v21  ;;  %v1117_v23 = vsel %vm460_vm0, %v3841_v46, -inf }
 0x2df   : > { %1115 = vmax.xlane.f32.xlu1 %v1114_v49 }
 0x2e1   : > { %1118 = vmax.xlane.f32.xlu0 %v1117_v23 }
 0x2f0   : > { %1837 = vrot.lane.b32.xlu1 %v3534_v39, %s3286_s6 }
 0x2f7   : > { %1776 = vrot.lane.b32.xlu0 %v3526_v33, %s3286_s6 }
 0x318   : > { %v1050_v56 = vpop.xlane.xlu0 %1049 }
 0x319   : > { %v1140_v58 = vsub.f32 %v3649_v25, %v1050_v56 }
 0x31b   : > { %v1174_v61 = vmul.f32 1.442695, %v1140_v58  ;;  %v1047_v0 = vpop.xlane.xlu1 %1046 }
 0x31c   : > { %v1044_v1 = vpop.xlane.xlu0 %1043  ;;  %v1139_v2 = vsub.f32 %v3667_v35, %v1047_v0 }
 0x31d   : > { %3056 = vpow2.f32 %v1174_v61  ;;  %v1138_v39 = vsub.f32 %v3659_v30, %v1044_v1 }
 0x31e   : > { %v1172_v14 = vmul.f32 1.442695, %v1139_v2 }
 0x31f   : > { %v1170_v33 = vmul.f32 1.442695, %v1138_v39 }
 0x320   : > { %v1053_v5 = vpop.xlane.xlu0 %1052 }
 0x321   : > { %3058 = vpow2.f32 %v1170_v33  ;;  %v1141_v7 = vsub.f32 %v3675_v40, %v1053_v5 }
 0x323   : > { %v1176_v18 = vmul.f32 1.442695, %v1141_v7 }
 0x325   : > { %3060 = vpow2.f32 %v1176_v18 }
 0x326   : > { %3062 = vpow2.f32 %v1172_v14 }
 0x327   : > { %v3863_v20 = vpop.eup %3056 }
 0x328   : > { %v1062_v25 = vpop.xlane.xlu1 %1061  ;;  %v1240_v22 = vsel %vm460_vm0, %v3863_v20, 0.0 }
 0x329   : > { %v1144_v26 = vsub.f32 %v3681_v43, %v1062_v25  ;;  %1241 = vadd.xlane.f32.xlu1 %v1240_v22 }
 0x32a   : > { %v1065_v30 = vpop.xlane.xlu0 %1064 }
 0x32b   : > { %v3868_v35 = vpop.eup %3058  ;;  %v1182_v29 = vmul.f32 1.442695, %v1144_v26  ;;  %v1145_v36 = vsub.f32 %v3691_v48, %v1065_v30 }
 0x32c   : > { %v1056_v40 = vpop.xlane.xlu1 %1055  ;;  %v1234_v44 = vsel %vm460_vm0, %v3868_v35, 0.0 }
 0x32d   : > { %3064 = vpow2.f32 %v1182_v29  ;;  %v1184_v21 = vmul.f32 1.442695, %v1145_v36  ;;  %v1142_v49 = vsub.f32 %v3687_v47, %v1056_v40  ;;  %1235 = vadd.xlane.f32.xlu1 %v1234_v44 }
 0x32e   : > { %v1059_v23 = vpop.xlane.xlu0 %1058 }
 0x32f   : > { %v3874_v56 = vpop.eup %3060  ;;  %3066 = vpow2.f32 %v1184_v21  ;;  %v1178_v43 = vmul.f32 1.442695, %v1142_v49  ;;  %v1143_v58 = vsub.f32 %v3697_v51, %v1059_v23 }
 0x330   : > { %v1243_v61 = vsel %vm460_vm0, %v3874_v56, 0.0  ;;  %v3879_v48 = vpop.eup %3062 }
 0x331   : > { %3068 = vpow2.f32 %v1178_v43  ;;  %v1180_v0 = vmul.f32 1.442695, %v1143_v58  ;;  %1244 = vadd.xlane.f32.xlu0 %v1243_v61  ;;  %v1237_v47 = vsel %vm460_vm0, %v3879_v48, 0.0 }
 0x333   : > { %3070 = vpow2.f32 %v1180_v0 }
 0x335   : > { %1238 = vadd.xlane.f32.xlu0 %v1237_v47 }
 0x337   : > { %v3883_v1 = vpop.eup %3064 }
 0x338   : > { %v1074_v39 = vpop.xlane.xlu1 %1073  ;;  %v1252_v2 = vsel %vm460_vm0, %v3883_v1, 0.0 }
 0x339   : > { %v3887_v51 = vpop.eup %3066  ;;  %v1148_v33 = vsub.f32 %v3705_v55, %v1074_v39  ;;  %1253 = vadd.xlane.f32.xlu1 %v1252_v2 }
 0x33a   : > { %v1077_v5 = vpop.xlane.xlu0 %1076  ;;  %v1255_v7 = vsel %vm460_vm0, %v3887_v51, 0.0 }
 0x33b   : > { %v3892_v14 = vpop.eup %3068  ;;  %v1190_v18 = vmul.f32 1.442695, %v1148_v33  ;;  %v1149_v25 = vsub.f32 %v3715_v60, %v1077_v5  ;;  %1256 = vadd.xlane.f32.xlu0 %v1255_v7 }
 0x33c   : > { %v1068_v22 = vpop.xlane.xlu1 %1067  ;;  %v1246_v26 = vsel %vm460_vm0, %v3892_v14, 0.0 }
 0x33d   : > { %v3897_v30 = vpop.eup %3070  ;;  %3072 = vpow2.f32 %v1190_v18  ;;  %v1192_v29 = vmul.f32 1.442695, %v1149_v25  ;;  %v1146_v55 = vsub.f32 %v3711_v59, %v1068_v22  ;;  %1247 = vadd.xlane.f32.xlu1 %v1246_v26 }
 0x33e   : > { %v1071_v36 = vpop.xlane.xlu0 %1070  ;;  %v1249_v40 = vsel %vm460_vm0, %v3897_v30, 0.0 }
 0x33f   : > { %3074 = vpow2.f32 %v1192_v29  ;;  %v1186_v44 = vmul.f32 1.442695, %v1146_v55  ;;  %v1147_v60 = vsub.f32 %v3721_v63, %v1071_v36  ;;  %1250 = vadd.xlane.f32.xlu0 %v1249_v40 }
 0x341   : > { %3076 = vpow2.f32 %v1186_v44  ;;  %v1188_v21 = vmul.f32 1.442695, %v1147_v60  ;;  %v1110_v49 = vpop.xlane.xlu1 %1109 }
 0x342   : > { %v1160_v23 = vsub.f32 %v3729_v3, %v1110_v49 }
 0x343   : > { %3078 = vpow2.f32 %v1188_v21  ;;  %v1113_v43 = vpop.xlane.xlu0 %1112 }
 0x344   : > { %v1214_v58 = vmul.f32 1.442695, %v1160_v23  ;;  %v1161_v59 = vsub.f32 %v3739_v11, %v1113_v43 }
 0x345   : > { %v1104_v61 = vpop.xlane.xlu1 %1103 }
 0x346   : > { %3080 = vpow2.f32 %v1214_v58  ;;  %v1158_v0 = vsub.f32 %v3735_v8, %v1104_v61  ;;  %v1216_v5 = vmul.f32 1.442695, %v1161_v59 }
 0x347   : > { %v3906_v47 = vpop.eup %3072  ;;  %v1107_v39 = vpop.xlane.xlu0 %1106 }
 0x348   : > { %v1210_v2 = vmul.f32 1.442695, %v1158_v0  ;;  %v1264_v63 = vsel %vm460_vm0, %v3906_v47, 0.0  ;;  %v1159_v3 = vsub.f32 %v3745_v15, %v1107_v39 }
 0x349   : > { %v3910_v33 = vpop.eup %3074  ;;  %v1086_v7 = vpop.xlane.xlu1 %1085  ;;  %1265 = vadd.xlane.f32.xlu1 %v1264_v63 }
 0x34a   : > { %3082 = vpow2.f32 %v1210_v2  ;;  %v1152_v11 = vsub.f32 %v3751_v19, %v1086_v7  ;;  %v1267_v8 = vsel %vm460_vm0, %v3910_v33, 0.0  ;;  %v1212_v15 = vmul.f32 1.442695, %v1159_v3 }
 0x34b   : > { %v3916_v18 = vpop.eup %3076  ;;  %v1089_v25 = vpop.xlane.xlu0 %1088  ;;  %1268 = vadd.xlane.f32.xlu0 %v1267_v8  ;;  %3084 = vpow2.f32 %v1216_v5 }
 0x34c   : > { %v1198_v22 = vmul.f32 1.442695, %v1152_v11  ;;  %v1258_v26 = vsel %vm460_vm0, %v3916_v18, 0.0  ;;  %v1153_v55 = vsub.f32 %v3759_v28, %v1089_v25 }
 0x34d   : > { %v3920_v29 = vpop.eup %3078  ;;  %v1080_v36 = vpop.xlane.xlu1 %1079  ;;  %1259 = vadd.xlane.f32.xlu1 %v1258_v26 }
 0x34e   : > { %3086 = vpow2.f32 %v1198_v22  ;;  %v1150_v19 = vsub.f32 %v3763_v32, %v1080_v36  ;;  %v1261_v40 = vsel %vm460_vm0, %v3920_v29, 0.0  ;;  %v1200_v49 = vmul.f32 1.442695, %v1153_v55 }
 0x34f   : > { %v1083_v44 = vpop.xlane.xlu0 %1082  ;;  %1262 = vadd.xlane.f32.xlu0 %v1261_v40  ;;  %3088 = vpow2.f32 %v1212_v15 }
 0x350   : > { %v3926_v60 = vpop.eup %3080  ;;  %v1194_v21 = vmul.f32 1.442695, %v1150_v19  ;;  %v1151_v23 = vsub.f32 %v3769_v38, %v1083_v44 }
 0x351   : > { %v1134_v43 = vpop.xlane.xlu1 %1133  ;;  %v1300_v58 = vsel %vm460_vm0, %v3926_v60, 0.0 }
 0x352   : > { %3090 = vpow2.f32 %v1194_v21  ;;  %v1168_v28 = vsub.f32 %v3777_v45, %v1134_v43  ;;  %v1196_v39 = vmul.f32 1.442695, %v1151_v23 }
 0x353   : > { %v1137_v32 = vpop.xlane.xlu0 %1136  ;;  %1301 = vadd.xlane.f32.xlu0 %v1300_v58  ;;  %3092 = vpow2.f32 %v1200_v49 }
 0x354   : > { %v3932_v59 = vpop.eup %3082  ;;  %v1230_v61 = vmul.f32 1.442695, %v1168_v28  ;;  %v1169_v0 = vsub.f32 %v3787_v53, %v1137_v32 }
 0x355   : > { %v1128_v2 = vpop.xlane.xlu1 %1127  ;;  %v1294_v63 = vsel %vm460_vm0, %v3932_v59, 0.0  ;;  %v3938_v45 = vpop.eup %3084 }
 0x356   : > { %3094 = vpow2.f32 %v1230_v61  ;;  %v1166_v38 = vsub.f32 %v3783_v52, %v1128_v2  ;;  %v1232_v7 = vmul.f32 1.442695, %v1169_v0  ;;  %v1303_v52 = vsel %vm460_vm0, %v3938_v45, 0.0 }
 0x357   : > { %v1131_v5 = vpop.xlane.xlu0 %1130  ;;  %1295 = vadd.xlane.f32.xlu0 %v1294_v63  ;;  %3096 = vpow2.f32 %v1196_v39 }
 0x358   : > { %v3940_v3 = vpop.eup %3086  ;;  %v1226_v11 = vmul.f32 1.442695, %v1166_v38  ;;  %v1167_v8 = vsub.f32 %v3793_v57, %v1131_v5 }
 0x359   : > { %v1098_v53 = vpop.xlane.xlu1 %1097  ;;  %v1276_v25 = vsel %vm460_vm0, %v3940_v3, 0.0  ;;  %v3947_v22 = vpop.eup %3088 }
 0x35a   : > { %3098 = vpow2.f32 %v1226_v11  ;;  %1277 = vadd.xlane.f32.xlu1 %v1276_v25  ;;  %v1156_v26 = vsub.f32 %v3799_v62, %v1098_v53  ;;  %v1228_v57 = vmul.f32 1.442695, %v1167_v8  ;;  %v1297_v21 = vsel %vm460_vm0, %v3947_v22, 0.0 }
 0x35b   : > { %v1101_v15 = vpop.xlane.xlu0 %1100  ;;  %1304 = vadd.xlane.f32.xlu0 %v1303_v52  ;;  %3100 = vpow2.f32 %v1232_v7 }
 0x35c   : > { %v3950_v55 = vpop.eup %3090  ;;  %v1157_v36 = vsub.f32 %v3807_v6, %v1101_v15  ;;  %v1206_v62 = vmul.f32 1.442695, %v1156_v26  ;;  %3102 = vpow2.f32 %v1228_v57 }
 0x35d   : > { %v1092_v19 = vpop.xlane.xlu1 %1091  ;;  %v1270_v40 = vsel %vm460_vm0, %v3950_v55, 0.0  ;;  %v3958_v49 = vpop.eup %3092 }
 0x35e   : > { %v1154_v44 = vsub.f32 %v3811_v12, %v1092_v19  ;;  %1271 = vadd.xlane.f32.xlu1 %v1270_v40  ;;  %v1208_v28 = vmul.f32 1.442695, %v1157_v36  ;;  %v1279_v12 = vsel %vm460_vm0, %v3958_v49, 0.0 }
 0x35f   : > { %v1095_v23 = vpop.xlane.xlu0 %1094  ;;  %1298 = vadd.xlane.f32.xlu0 %v1297_v21 }
 0x360   : > { %v3960_v43 = vpop.eup %3094  ;;  %v1202_v6 = vmul.f32 1.442695, %v1154_v44  ;;  %v1155_v58 = vsub.f32 %v3817_v16, %v1095_v23 }
 0x361   : > { %v1324_v32 = vsel %vm460_vm0, %v3960_v43, 0.0  ;;  %v3967_v61 = vpop.eup %3096 }
 0x362   : > { %3104 = vpow2.f32 %v1202_v6  ;;  %1325 = vadd.xlane.f32.xlu1 %v1324_v32  ;;  %v1204_v39 = vmul.f32 1.442695, %v1155_v58  ;;  %v1273_v38 = vsel %vm460_vm0, %v3967_v61, 0.0 }
 0x363   : > { %3106 = vpow2.f32 %v1206_v62  ;;  %1280 = vadd.xlane.f32.xlu0 %v1279_v12 }
 0x364   : > { %v3969_v0 = vpop.eup %3098  ;;  %3108 = vpow2.f32 %v1208_v28 }
 0x365   : > { %v1318_v2 = vsel %vm460_vm0, %v3969_v0, 0.0  ;;  %v3973_v16 = vpop.eup %3100  ;;  %3110 = vpow2.f32 %v1204_v39 }
 0x366   : > { %1319 = vadd.xlane.f32.xlu1 %v1318_v2  ;;  %v1327_v7 = vsel %vm460_vm0, %v3973_v16, 0.0  ;;  %v3980_v11 = vpop.eup %3102 }
 0x367   : > { %1274 = vadd.xlane.f32.xlu0 %v1273_v38  ;;  %v1321_v36 = vsel %vm460_vm0, %v3980_v11, 0.0 }
 0x368   : > { %v1122_v63 = vpop.xlane.xlu1 %1121 }
 0x369   : > { %v1164_v5 = vsub.f32 %v3825_v24, %v1122_v63 }
 0x36a   : > { %1328 = vadd.xlane.f32.xlu1 %v1327_v7  ;;  %v1125_v8 = vpop.xlane.xlu0 %1124 }
 0x36b   : > { %v1222_v53 = vmul.f32 1.442695, %v1164_v5  ;;  %v1165_v25 = vsub.f32 %v3835_v42, %v1125_v8 }
 0x36c   : > { %v3983_v52 = vpop.eup %3104  ;;  %v1116_v26 = vpop.xlane.xlu1 %1115 }
 0x36d   : > { %v3985_v15 = vpop.eup %3106  ;;  %3112 = vpow2.f32 %v1222_v53  ;;  %v1162_v57 = vsub.f32 %v3831_v41, %v1116_v26  ;;  %v1282_v24 = vsel %vm460_vm0, %v3983_v52, 0.0  ;;  %v1224_v40 = vmul.f32 1.442695, %v1165_v25 }
 0x36e   : > { %v3992_v19 = vpop.eup %3108  ;;  %1283 = vadd.xlane.f32.xlu0 %v1282_v24  ;;  %1322 = vadd.xlane.f32.xlu1 %v1321_v36  ;;  %v1119_v42 = vpop.xlane.xlu0 %1118  ;;  %v1288_v41 = vsel %vm460_vm0, %v3985_v15, 0.0 }
 0x36f   : > { %v1218_v44 = vmul.f32 1.442695, %v1162_v57  ;;  %v1163_v21 = vsub.f32 %v3841_v46, %v1119_v42  ;;  %v1291_v23 = vsel %vm460_vm0, %v3992_v19, 0.0  ;;  %v3999_v28 = vpop.eup %3110 }
 0x370   : > { %v1285_v6 = vsel %vm460_vm0, %v3999_v28, 0.0  ;;  %v4023_v5 = vpop.permute.xlu1 %1837 }
 0x371   : > { %3114 = vpow2.f32 %v1218_v44  ;;  %v1220_v62 = vmul.f32 1.442695, %v1163_v21 }
 0x372   : > { %3116 = vpow2.f32 %v1224_v40  ;;  %1289 = vadd.xlane.f32.xlu1 %v1288_v41  ;;  %1292 = vadd.xlane.f32.xlu0 %v1291_v23  ;;  %v4025_v8 = vpop.permute.xlu0 %1776 }
 0x373   : > { %3118 = vpow2.f32 %v1220_v62 }
 0x376   : > { %1286 = vadd.xlane.f32.xlu0 %v1285_v6 }
 0x377   : > { %v4003_v58 = vpop.eup %3112 }
 0x378   : > { %v1312_v46 = vsel %vm460_vm0, %v4003_v58, 0.0 }
 0x379   : > { %1313 = vadd.xlane.f32.xlu1 %v1312_v46 }
 0x37b   : > { %v4007_v32 = vpop.eup %3114 }
 0x37c   : > { %v4009_v12 = vpop.eup %3116  ;;  %v1306_v39 = vsel %vm460_vm0, %v4007_v32, 0.0 }
 0x37d   : > { %v4013_v2 = vpop.eup %3118  ;;  %1307 = vadd.xlane.f32.xlu1 %v1306_v39  ;;  %v1315_v63 = vsel %vm460_vm0, %v4009_v12, 0.0 }
 0x37e   : > { %v1309_v38 = vsel %vm460_vm0, %v4013_v2, 0.0 }
 0x37f   : > { %1310 = vadd.xlane.f32.xlu0 %v1309_v38 }
 0x381   : > { %1316 = vadd.xlane.f32.xlu1 %v1315_v63 }
 0x392   : > { %1839 = vrot.lane.b32.xlu1 %v3532_v37, %s3286_s6 }
 0x395   : > { %1778 = vrot.lane.b32.xlu0 %v3524_v31, %s3286_s6 }
 0x3b6   : > { %v1242_v7 = vpop.xlane.xlu1 %1241 }
 0x3ba   : > { %v1236_v53 = vpop.xlane.xlu1 %1235 }
 0x3be   : > { %v1245_v25 = vpop.xlane.xlu0 %1244 }
 0x3bf   : > { %3120 = vrcp.f32 %v1245_v25 }
 0x3c0   : > { %3122 = vrcp.f32 %v1236_v53 }
 0x3c1   : > { %3124 = vrcp.f32 %v1242_v7 }
 0x3c2   : > { %v1239_v26 = vpop.xlane.xlu0 %1238 }
 0x3c3   : > { %3126 = vrcp.f32 %v1239_v26 }
 0x3c6   : > { %v1254_v57 = vpop.xlane.xlu1 %1253 }
 0x3c8   : > { %v1257_v24 = vpop.xlane.xlu0 %1256 }
 0x3c9   : > { %v3121_v36 = vpop.eup %3120  ;;  %3128 = vrcp.f32 %v1257_v24 }
 0x3ca   : > { %v1248_v37 = vpop.xlane.xlu1 %1247  ;;  %v3123_v40 = vpop.eup %3122  ;;  %v1365_v21 = vmul.f32 %v3121_v36, %v3874_v56 }
 0x3cb   : > { %3130 = vrcp.f32 %v1248_v37  ;;  %v3125_v31 = vpop.eup %3124  ;;  %v1362_v62 = vmul.f32 %v3123_v40, %v3868_v35 }
 0x3cc   : > { %3132 = vrcp.f32 %v1254_v57  ;;  %v1251_v42 = vpop.xlane.xlu0 %1250  ;;  %v1364_v23 = vmul.f32 %v3125_v31, %v3863_v20 }
 0x3cd   : > { %v3127_v44 = vpop.eup %3126  ;;  %3134 = vrcp.f32 %v1251_v42 }
 0x3ce   : > { %v1363_v41 = vmul.f32 %v3127_v44, %v3879_v48  ;;  %v1395_v46 = vpack.c.bf16 %v1365_v21, %v1364_v23 }
 0x3d0   : > { %v1394_v6 = vpack.c.bf16 %v1363_v41, %v1362_v62 }
 0x3d2   : > { %2919 = vmatprep.mubr.msk.bf16.mxu1 %vm460_vm0, %v1394_v6 }
 0x3d3   : > { %2920 = vmatmul.mubr.msk.bf16.vlgmr.msra.gmra.mrb[24].mxu1 %vm460_vm0, %v1395_v46  ;;  %v3129_v39 = vpop.eup %3128 }
 0x3d4   : > { %2924 = vmatpush3.bf16.msra.mxu1 %v3602_v4  ;;  %v1369_v35 = vmul.f32 %v3129_v39, %v3887_v51 }
 0x3d5   : > { %v3131_v38 = vpop.eup %3130  ;;  %2925 = vmatprep.subr.bf16.mxu1 %v3612_v9 }
 0x3d6   : > { %v3133_v56 = vpop.eup %3132  ;;  %v1266_v63 = vpop.xlane.xlu1 %1265  ;;  %v1366_v48 = vmul.f32 %v3131_v38, %v3892_v14 }
 0x3d7   : > { %v3135_v7 = vpop.eup %3134  ;;  %v1368_v25 = vmul.f32 %v3133_v56, %v3883_v1 }
 0x3d8   : > { %2926 = vmatpush3.bf16.msra.mxu1 %v3612_v9  ;;  %v1269_v20 = vpop.xlane.xlu0 %1268  ;;  %v1367_v53 = vmul.f32 %v3135_v7, %v3897_v30 }
 0x3d9   : > { %2939 = vmatprep.subr.bf16.mxu1 %v3614_v10  ;;  %3136 = vrcp.f32 %v1269_v20  ;;  %v1397_v57 = vpack.c.bf16 %v1369_v35, %v1368_v25 }
 0x3da   : > { %v1260_v4 = vpop.xlane.xlu1 %1259  ;;  %v1396_v26 = vpack.c.bf16 %v1367_v53, %v1366_v48 }
 0x3db   : > { %3138 = vrcp.f32 %v1260_v4 }
 0x3dc   : > { %3140 = vrcp.f32 %v1266_v63  ;;  %2927 = vmatprep.mubr.msk.bf16.mxu1 %vm460_vm0, %v1396_v26  ;;  %v1263_v51 = vpop.xlane.xlu0 %1262 }
 0x3dd   : > { %3142 = vrcp.f32 %v1263_v51  ;;  %2928 = vmatmul.mubr.msk.bf16.vlgmr.msra.gmra.mrb[28].mxu1 %vm460_vm0, %v1397_v57 }
 0x3de   : > { %2940 = vmatpush3.bf16.msra.mxu1 %v3614_v10 }
 0x3df   : > { %2941 = vmatprep.subr.bf16.mxu1 %v3851_v34 }
 0x3e0   : > { %v1302_v9 = vpop.xlane.xlu0 %1301 }
 0x3e2   : > { %2942 = vmatpush3.bf16.msra.mxu1 %v3851_v34 }
 0x3e3   : > { %2955 = vmatprep.subr.bf16.mxu1 %v3853_v27  ;;  %v3137_v1 = vpop.eup %3136 }
 0x3e4   : > { %v1296_v14 = vpop.xlane.xlu0 %1295  ;;  %v1373_v37 = vmul.f32 %v3137_v1, %v3910_v33 }
 0x3e5   : > { %v3139_v30 = vpop.eup %3138  ;;  %3144 = vrcp.f32 %v1296_v14 }
 0x3e6   : > { %v3141_v24 = vpop.eup %3140  ;;  %v1370_v42 = vmul.f32 %v3139_v30, %v3916_v18 }
 0x3e7   : > { %v3143_v36 = vpop.eup %3142  ;;  %v1278_v40 = vpop.xlane.xlu1 %1277  ;;  %v1372_v44 = vmul.f32 %v3141_v24, %v3906_v47 }
 0x3e8   : > { %v1305_v31 = vpop.xlane.xlu0 %1304  ;;  %v1371_v10 = vmul.f32 %v3143_v36, %v3920_v29 }
 0x3e9   : > { %v1399_v34 = vpack.c.bf16 %v1373_v37, %v1372_v44 }
 0x3ea   : > { %v1398_v21 = vpack.c.bf16 %v1371_v10, %v1370_v42 }
 0x3eb   : > { %v1272_v62 = vpop.xlane.xlu1 %1271 }
 0x3ec   : > { %2935 = vmatprep.mubr.msk.bf16.mxu0 %vm460_vm0, %v1398_v21  ;;  %v1299_v41 = vpop.xlane.xlu0 %1298  ;;  %3146 = vrcp.f32 %v1272_v62 }
 0x3ed   : > { %2936 = vmatmul.mubr.msk.bf16.vlgmr.msra.gmra.mrb[40].mxu0 %vm460_vm0, %v1399_v34 }
 0x3ee   : > { %2948 = vmatpush3.bf16.msra.mxu0 %v3620_v13 }
 0x3ef   : > { %v1326_v23 = vpop.xlane.xlu1 %1325  ;;  %2949 = vmatprep.subr.bf16.mxu0 %v3855_v50  ;;  %v3145_v6 = vpop.eup %3144 }
 0x3f0   : > { %v1281_v33 = vpop.xlane.xlu0 %1280  ;;  %v1382_v57 = vmul.f32 %v3145_v6, %v3932_v59 }
 0x3f1   : > { %3148 = vrcp.f32 %v1281_v33 }
 0x3f2   : > { %2950 = vmatpush3.bf16.msra.mxu0 %v3855_v50  ;;  %3150 = vrcp.f32 %v1299_v41 }
 0x3f3   : > { %v1320_v47 = vpop.xlane.xlu1 %1319  ;;  %2963 = vmatprep.subr.bf16.mxu0 %v4025_v8  ;;  %3152 = vrcp.f32 %v1278_v40 }
 0x3f4   : > { %v1275_v18 = vpop.xlane.xlu0 %1274 }
 0x3f5   : > { %3154 = vrcp.f32 %v1275_v18 }
 0x3f6   : > { %3156 = vrcp.f32 %v1305_v31  ;;  %v3147_v13 = vpop.eup %3146 }
 0x3f7   : > { %v1329_v29 = vpop.xlane.xlu1 %1328  ;;  %3158 = vrcp.f32 %v1302_v9  ;;  %v1374_v48 = vmul.f32 %v3147_v13, %v3950_v55 }
 0x3fb   : > { %v1323_v46 = vpop.xlane.xlu1 %1322  ;;  %v1284_v39 = vpop.xlane.xlu0 %1283 }
 0x3fc   : > { %v3149_v38 = vpop.eup %3148  ;;  %3160 = vrcp.f32 %v1323_v46 }
 0x3fd   : > { %v3151_v56 = vpop.eup %3150  ;;  %3162 = vrcp.f32 %v1320_v47  ;;  %v1377_v7 = vmul.f32 %v3149_v38, %v3958_v49 }
 0x3fe   : > { %v3153_v63 = vpop.eup %3152  ;;  %v1383_v25 = vmul.f32 %v3151_v56, %v3947_v22 }
 0x3ff   : > { %v3155_v50 = vpop.eup %3154  ;;  %v1290_v35 = vpop.xlane.xlu1 %1289  ;;  %v1376_v4 = vmul.f32 %v3153_v63, %v3940_v3 }
 0x400   : > { %v1293_v20 = vpop.xlane.xlu0 %1292  ;;  %3164 = vrcp.f32 %v1290_v35  ;;  %v1375_v53 = vmul.f32 %v3155_v50, %v3967_v61  ;;  %v3157_v49 = vpop.eup %3156  ;;  %v1404_v1 = vpack.c.bf16 %v1383_v25, %v1382_v57 }
 0x401   : > { %3166 = vrcp.f32 %v1293_v20  ;;  %v1401_v9 = vpack.c.bf16 %v1377_v7, %v1376_v4  ;;  %v3159_v55 = vpop.eup %3158  ;;  %v1385_v59 = vmul.f32 %v3157_v49, %v3938_v45  ;;  %v3287_v7 = vmov 1983009808  }
 0x402   : > { %3168 = vrcp.f32 %v1284_v39  ;;  %v1400_v26 = vpack.c.bf16 %v1375_v53, %v1374_v48  ;;  %v1384_v30 = vmul.f32 %v3159_v55, %v3926_v60  ;;  %v1901_v35 = vunpack.c.l.s4 %v3287_v7 }
 0x403   : > { %3170 = vrcp.f32 %v1329_v29 }
 0x404   : > { %v1287_v51 = vpop.xlane.xlu0 %1286  ;;  %2943 = vmatprep.mubr.msk.bf16.mxu1 %vm460_vm0, %v1400_v26 }
 0x405   : > { %3172 = vrcp.f32 %v1287_v51  ;;  %2944 = vmatmul.mubr.msk.bf16.vlgmr.msra.gmra.mrb[32].mxu1 %vm460_vm0, %v1401_v9 }
 0x406   : > { %v3161_v61 = vpop.eup %3160  ;;  %3174 = vrcp.f32 %v1326_v23  ;;  %2956 = vmatpush3.bf16.msra.mxu1 %v3853_v27  ;;  %v1314_v3 = vpop.xlane.xlu1 %1313  ;;  %2959 = vmatprep.mubr.msk.bf16.mxu1 %vm460_vm0, %v1404_v1  ;;  %v1405_v27 = vpack.c.bf16 %v1385_v59, %v1384_v30 }
 0x407   : > { %v3163_v22 = vpop.eup %3162  ;;  %2957 = vmatprep.subr.bf16.mxu1 %v3857_v54  ;;  %v1391_v14 = vmul.f32 %v3161_v61, %v3980_v11 }
 0x408   : > { %v1390_v37 = vmul.f32 %v3163_v22, %v3969_v0 }
 0x40a   : > { %v3165_v24 = vpop.eup %3164  ;;  %2958 = vmatpush3.bf16.msra.mxu1 %v3857_v54  ;;  %v1308_v36 = vpop.xlane.xlu1 %1307  ;;  %v1408_v42 = vpack.c.bf16 %v1391_v14, %v1390_v37  ;;  %v3288_v37 = vmov 1934713408  }
 0x40b   : > { %v3167_v40 = vpop.eup %3166  ;;  %3176 = vrcp.f32 %v1308_v36  ;;  %2971 = vmatprep.subr.bf16.mxu1 %v4023_v5  ;;  %v1380_v11 = vmul.f32 %v3165_v24, %v3985_v15 }
 0x40c   : > { %v3169_v31 = vpop.eup %3168  ;;  %3178 = vrcp.f32 %v1314_v3  ;;  %v1311_v45 = vpop.xlane.xlu0 %1310  ;;  %v1381_v54 = vmul.f32 %v3167_v40, %v3992_v19  ;;  %v1965_v40 = vunpack.c.l.s4 %v3288_v37 }
 0x40d   : > { %v3171_v10 = vpop.eup %3170  ;;  %3180 = vrcp.f32 %v1311_v45  ;;  %2960 = vmatmul.mubr.msk.bf16.vlgmr.msra.gmra.mrb[36].mxu1 %vm460_vm0, %v1405_v27  ;;  %v1378_v44 = vmul.f32 %v3169_v31, %v3983_v52 }
 0x40e   : > { %2972 = vmatpush3.bf16.msra.mxu1 %v4023_v5  ;;  %v1317_v0 = vpop.xlane.xlu1 %1316  ;;  %2975 = vmatprep.mubr.msk.bf16.mxu1 %vm460_vm0, %v1408_v42  ;;  %v1393_v34 = vmul.f32 %v3171_v10, %v3973_v16  ;;  %v1403_v33 = vpack.c.bf16 %v1381_v54, %v1380_v11  ;;  %v1966_v27 = vunpack.c.0.s8 %v1965_v40 }
 0x40f   : > { %v3173_v60 = vpop.eup %3172  ;;  %3182 = vrcp.f32 %v1317_v0 }
 0x410   : > { %v1379_v21 = vmul.f32 %v3173_v60, %v3999_v28  ;;  %v3175_v62 = vpop.eup %3174  ;;  %v1779_v5 = vpop.permute.xlu0 %1778  ;;  %v4107_v60 = vsub.s32 %v1966_v27, %v3633_v17 }
 0x411   : > { %v1392_v15 = vmul.f32 %v3175_v62, %v3960_v43 }
 0x412   : > { %v1402_v41 = vpack.c.bf16 %v1379_v21, %v1378_v44  ;;  %v1840_v23 = vpop.permute.xlu1 %1839 }
 0x413   : > { %2973 = vmatprep.subr.bf16.mxu1 %v1840_v23  ;;  %v1409_v52 = vpack.c.bf16 %v1393_v34, %v1392_v15 }
 0x414   : > { %2951 = vmatprep.mubr.msk.bf16.mxu0 %vm460_vm0, %v1402_v41  ;;  %2974 = vmatpush3.bf16.msra.mxu1 %v1840_v23 }
 0x415   : > { %2952 = vmatmul.mubr.msk.bf16.vlgmr.msra.gmra.mrb[44].mxu0 %vm460_vm0, %v1403_v33  ;;  %v3177_v19 = vpop.eup %3176 }
 0x416   : > { %2964 = vmatpush3.bf16.msra.mxu0 %v4025_v8  ;;  %v3179_v28 = vpop.eup %3178  ;;  %v1386_v16 = vmul.f32 %v3177_v19, %v4007_v32 }
 0x417   : > { %2965 = vmatprep.subr.bf16.mxu0 %v1779_v5  ;;  %v3181_v47 = vpop.eup %3180  ;;  %2976 = vmatmul.mubr.msk.bf16.vlgmr.msra.gmra.mrb[40].mxu1 %vm460_vm0, %v1409_v52  ;;  %v1388_v29 = vmul.f32 %v3179_v28, %v4003_v58  ;;  %v1902_v58 = vunpack.c.0.s8 %v1901_v35 }
 0x418   : > { %v1387_v43 = vmul.f32 %v3181_v47, %v4013_v2 }
 0x419   : > { %v3183_v18 = vpop.eup %3182 }
 0x41a   : > { %2966 = vmatpush3.bf16.msra.mxu0 %v1779_v5  ;;  %v1389_v6 = vmul.f32 %v3183_v18, %v4009_v12  ;;  %v1406_v13 = vpack.c.bf16 %v1387_v43, %v1386_v16  ;;  %v4096_v12 = vsub.s32 %v1902_v58, %v3633_v17 }
 0x41c   : > { %2967 = vmatprep.mubr.msk.bf16.mxu0 %vm460_vm0, %v1406_v13  ;;  %v1407_v8 = vpack.c.bf16 %v1389_v6, %v1388_v29 }
 0x41e   : > { %2968 = vmatmul.mubr.msk.bf16.vlgmr.msra.gmra.mrb[48].mxu0 %vm460_vm0, %v1407_v8 }
 0x4a6   : > { %v2921_v46 = vpop.f32.mrb[24].mxu1 }
 0x4a7   : > { %v1456_v39 = vpop.f32.mrb[25].mxu1 }
 0x4a8   : > { %v2922_v38 = vpop.f32.mrb[26].mxu1 }
 0x4a9   : > { %v1459_v56 = vpop.f32.mrb[27].mxu1 }
 0x4b0   : > { %v2929_v63 = vpop.f32.mrb[28].mxu1 }
 0x4b1   : > { %v1517_v32 = vpop.f32.mrb[29].mxu1 }
 0x4b2   : > { %v2930_v50 = vpop.f32.mrb[30].mxu1 }
 0x4b3   : > { %v4093_v2 = vpop.f32.mrb[31].mxu1 }
 0x4c0   : > { %v2937_v20 = vpop.f32.mrb[40].mxu0 }
 0x4c1   : > { %v2170_v48 = vcombine.low %v2921_v46, %v2937_v20  ;;  %v2171_v53 = vcombine.high %v2921_v46, %v2937_v20  ;;  %v1578_v25 = vpop.f32.mrb[41].mxu0 }
 0x4c2   : > { %v1898_v4 = vcombine.low %v1456_v39, %v1578_v25  ;;  %v1899_v26 = vcombine.high %v1456_v39, %v1578_v25  ;;  %v2938_v57 = vpop.f32.mrb[42].mxu0 }
 0x4c3   : > { %v2178_v51 = vrot.slane %v2170_v48, %v4096_v12  ;;  %v2185_v9 = vrot.slane %v2171_v53, %v4096_v12  ;;  %v2306_v49 = vcombine.low %v2922_v38, %v2938_v57  ;;  %v2307_v1 = vcombine.high %v2922_v38, %v2938_v57  ;;  %v1581_v55 = vpop.f32.mrb[43].mxu0 }
 0x4c4   : > { %v1906_v61 = vrot.slane %v1898_v4, %v4096_v12  ;;  %v1913_v3 = vrot.slane %v1899_v26, %v4096_v12  ;;  %v2034_v22 = vcombine.low %v1459_v56, %v1581_v55  ;;  %v2035_v59 = vcombine.high %v1459_v56, %v1581_v55 }
 0x4c5   : > { %v2314_v14 = vrot.slane %v2306_v49, %v4096_v12  ;;  %v2321_v30 = vrot.slane %v2307_v1, %v4096_v12 }
 0x4c6   : > { %v2042_v24 = vrot.slane %v2034_v22, %v4096_v12  ;;  %v2049_v36 = vrot.slane %v2035_v59, %v4096_v12 }
 0x4d8   : > { %v2945_v31 = vpop.f32.mrb[32].mxu1 }
 0x4d9   : > { %v2186_v45 = vcombine.low %v2929_v63, %v2945_v31  ;;  %v2187_v42 = vcombine.high %v2929_v63, %v2945_v31  ;;  %v1639_v10 = vpop.f32.mrb[33].mxu1 }
 0x4da   : > { %v1914_v11 = vcombine.low %v1517_v32, %v1639_v10  ;;  %v1915_v54 = vcombine.high %v1517_v32, %v1639_v10  ;;  %v2946_v0 = vpop.f32.mrb[34].mxu1 }
 0x4db   : > { %v2194_v44 = vrot.slane %v2186_v45, %v4096_v12  ;;  %v2201_v21 = vrot.slane %v2187_v42, %v4096_v12  ;;  %v2322_v62 = vcombine.low %v2930_v50, %v2946_v0  ;;  %v2323_v34 = vcombine.high %v2930_v50, %v2946_v0  ;;  %v1642_v41 = vpop.f32.mrb[35].mxu1 }
 0x4dc   : > { %v1922_v23 = vrot.slane %v1914_v11, %v4096_v12  ;;  %v1929_v33 = vrot.slane %v1915_v54, %v4096_v12  ;;  %v2050_v15 = vcombine.low %v4093_v2, %v1642_v41  ;;  %v2051_v19 = vcombine.high %v4093_v2, %v1642_v41 }
 0x4dd   : > { %v2234_v17 = vcombine.low %v2178_v51, %v2194_v44  ;;  %v2235_v5 = vcombine.high %v2178_v51, %v2194_v44  ;;  %v2250_v52 = vcombine.low %v2185_v9, %v2201_v21  ;;  %v2251_v28 = vcombine.high %v2185_v9, %v2201_v21 }
 0x4de   : > { %v1962_v47 = vcombine.low %v1906_v61, %v1922_v23  ;;  %v1963_v16 = vcombine.high %v1906_v61, %v1922_v23  ;;  %v1978_v43 = vcombine.low %v1913_v3, %v1929_v33  ;;  %v1979_v18 = vcombine.high %v1913_v3, %v1929_v33 }
 0x4df   : > { %v4116_v29 = vrot.slane %v2235_v5, %v4107_v60  ;;  %v4119_v6 = vrot.slane %v2251_v28, %v4107_v60  ;;  %v2330_v13 = vrot.slane %v2322_v62, %v4096_v12  ;;  %v2337_v8 = vrot.slane %v2323_v34, %v4096_v12 }
 0x4e0   : > { %v4124_v46 = vrot.slane %v1962_v47, %v4107_v60  ;;  %v4127_v39 = vrot.slane %v1963_v16, %v4107_v60  ;;  %v4130_v38 = vrot.slane %v1978_v43, %v4107_v60  ;;  %v4133_v56 = vrot.slane %v1979_v18, %v4107_v60  ;;  %v2961_v63 = vpop.f32.mrb[36].mxu1 }
 0x4e1   : > { %v2370_v32 = vcombine.low %v2314_v14, %v2330_v13  ;;  %v2371_v50 = vcombine.high %v2314_v14, %v2330_v13  ;;  %v2386_v2 = vcombine.low %v2321_v30, %v2337_v8  ;;  %v2387_v7 = vcombine.high %v2321_v30, %v2337_v8  ;;  %v1761_v35 = vpop.f32.mrb[37].mxu1 }
 0x4e2   : > { %v2058_v58 = vrot.slane %v2050_v15, %v4096_v12  ;;  %v2065_v20 = vrot.slane %v2051_v19, %v4096_v12  ;;  %v2962_v48 = vpop.f32.mrb[38].mxu1  ;;  %v4138_v53 = vrot.slane %v2250_v52, %v4107_v60  ;;  %v4141_v25 = vrot.slane %v2234_v17, %v4107_v60 }
 0x4e3   : > { %v4144_v4 = vrot.slane %v2370_v32, %v4107_v60  ;;  %v4147_v26 = vrot.slane %v2371_v50, %v4107_v60  ;;  %v4150_v57 = vrot.slane %v2386_v2, %v4107_v60  ;;  %v4153_v51 = vrot.slane %v2387_v7, %v4107_v60  ;;  %v1764_v9 = vpop.f32.mrb[39].mxu1 }
 0x4e4   : > { %v2098_v49 = vcombine.low %v2042_v24, %v2058_v58  ;;  %v2099_v1 = vcombine.high %v2042_v24, %v2058_v58  ;;  %v2114_v55 = vcombine.low %v2049_v36, %v2065_v20  ;;  %v2115_v61 = vcombine.high %v2049_v36, %v2065_v20 }
 0x4e6   : > { %v4156_v3 = vrot.slane %v2098_v49, %v4107_v60  ;;  %v4159_v22 = vrot.slane %v2099_v1, %v4107_v60  ;;  %v4162_v59 = vrot.slane %v2114_v55, %v4107_v60  ;;  %v4165_v14 = vrot.slane %v2115_v61, %v4107_v60 }
 0x4e8   : > { %v2953_v30 = vpop.f32.mrb[44].mxu0 }
 0x4e9   : > { %v1700_v37 = vpop.f32.mrb[45].mxu0 }
 0x4ea   : > { %v2954_v40 = vpop.f32.mrb[46].mxu0  ;;  %v2977_v31 = vpop.f32.mrb[40].mxu1 }
 0x4eb   : > { %v1703_v27 = vpop.f32.mrb[47].mxu0  ;;  %v2218_v24 = vcombine.low %v2961_v63, %v2977_v31  ;;  %v2219_v45 = vcombine.high %v2961_v63, %v2977_v31  ;;  %v1883_v36 = vpop.f32.mrb[41].mxu1 }
 0x4ec   : > { %v1946_v42 = vcombine.low %v1761_v35, %v1883_v36  ;;  %v1947_v10 = vcombine.high %v1761_v35, %v1883_v36  ;;  %v2978_v11 = vpop.f32.mrb[42].mxu1 }
 0x4ed   : > { %v2226_v54 = vrot.slane %v2218_v24, %v4096_v12  ;;  %v2233_v0 = vrot.slane %v2219_v45, %v4096_v12  ;;  %v2354_v44 = vcombine.low %v2962_v48, %v2978_v11  ;;  %v2355_v21 = vcombine.high %v2962_v48, %v2978_v11  ;;  %v1886_v62 = vpop.f32.mrb[43].mxu1 }
 0x4ee   : > { %v1954_v34 = vrot.slane %v1946_v42, %v4096_v12  ;;  %v1961_v41 = vrot.slane %v1947_v10, %v4096_v12  ;;  %v2082_v23 = vcombine.low %v1764_v9, %v1886_v62  ;;  %v2083_v33 = vcombine.high %v1764_v9, %v1886_v62 }
 0x4ef   : > { %v2362_v15 = vrot.slane %v2354_v44, %v4096_v12  ;;  %v2369_v19 = vrot.slane %v2355_v21, %v4096_v12 }
 0x4f0   : > { %v2090_v17 = vrot.slane %v2082_v23, %v4096_v12  ;;  %v2097_v5 = vrot.slane %v2083_v33, %v4096_v12 }
 0x4f1   : > { %v2969_v52 = vpop.f32.mrb[48].mxu0 }
 0x4f2   : > { %v2202_v28 = vcombine.low %v2953_v30, %v2969_v52  ;;  %v2203_v47 = vcombine.high %v2953_v30, %v2969_v52  ;;  %v1822_v16 = vpop.f32.mrb[49].mxu0 }
 0x4f3   : > { %v1930_v43 = vcombine.low %v1700_v37, %v1822_v16  ;;  %v1931_v18 = vcombine.high %v1700_v37, %v1822_v16  ;;  %v2970_v13 = vpop.f32.mrb[50].mxu0 }
 0x4f4   : > { %v2210_v8 = vrot.slane %v2202_v28, %v4096_v12  ;;  %v2217_v63 = vrot.slane %v2203_v47, %v4096_v12  ;;  %v2338_v32 = vcombine.low %v2954_v40, %v2970_v13  ;;  %v2339_v50 = vcombine.high %v2954_v40, %v2970_v13  ;;  %v1825_v2 = vpop.f32.mrb[51].mxu0 }
 0x4f5   : > { %v1938_v7 = vrot.slane %v1930_v43, %v4096_v12  ;;  %v1945_v35 = vrot.slane %v1931_v18, %v4096_v12  ;;  %v2066_v58 = vcombine.low %v1703_v27, %v1825_v2  ;;  %v2067_v20 = vcombine.high %v1703_v27, %v1825_v2 }
 0x4f6   : > { %v2266_v48 = vcombine.low %v2210_v8, %v2226_v54  ;;  %v2267_v9 = vcombine.high %v2210_v8, %v2226_v54  ;;  %v2282_v49 = vcombine.low %v2217_v63, %v2233_v0  ;;  %v2283_v1 = vcombine.high %v2217_v63, %v2233_v0 }
 0x4f7   : > { %v1994_v55 = vcombine.low %v1938_v7, %v1954_v34  ;;  %v1995_v61 = vcombine.high %v1938_v7, %v1954_v34  ;;  %v2010_v30 = vcombine.low %v1945_v35, %v1961_v41  ;;  %v2011_v37 = vcombine.high %v1945_v35, %v1961_v41 }
 0x4f8   : > { %v4180_v31 = vrot.slane %v2267_v9, %v4107_v60  ;;  %v4183_v40 = vrot.slane %v2283_v1, %v4107_v60  ;;  %v2346_v24 = vrot.slane %v2338_v32, %v4096_v12  ;;  %v2353_v45 = vrot.slane %v2339_v50, %v4096_v12 }
 0x4f9   : > { %v4188_v27 = vrot.slane %v1994_v55, %v4107_v60  ;;  %v4191_v36 = vrot.slane %v1995_v61, %v4107_v60  ;;  %v4194_v42 = vrot.slane %v2010_v30, %v4107_v60  ;;  %v4197_v10 = vrot.slane %v2011_v37, %v4107_v60 }
 0x4fa   : > { %v2402_v11 = vcombine.low %v2346_v24, %v2362_v15  ;;  %v2403_v54 = vcombine.high %v2346_v24, %v2362_v15  ;;  %v2418_v0 = vcombine.low %v2353_v45, %v2369_v19  ;;  %v2419_v44 = vcombine.high %v2353_v45, %v2369_v19 }
 0x4fb   : > { %v2074_v21 = vrot.slane %v2066_v58, %v4096_v12  ;;  %v2081_v62 = vrot.slane %v2067_v20, %v4096_v12  ;;  %v4202_v34 = vrot.slane %v2282_v49, %v4107_v60  ;;  %v4205_v41 = vrot.slane %v2266_v48, %v4107_v60 }
 0x4fc   : > { %v4208_v23 = vrot.slane %v2402_v11, %v4107_v60  ;;  %v4211_v33 = vrot.slane %v2403_v54, %v4107_v60  ;;  %v4214_v15 = vrot.slane %v2418_v0, %v4107_v60  ;;  %v4217_v19 = vrot.slane %v2419_v44, %v4107_v60 }
 0x4fd   : > { %v2130_v52 = vcombine.low %v2074_v21, %v2090_v17  ;;  %v2131_v12 = vcombine.high %v2074_v21, %v2090_v17  ;;  %v2146_v28 = vcombine.low %v2081_v62, %v2097_v5  ;;  %v2147_v47 = vcombine.high %v2081_v62, %v2097_v5 }
 0x4fe   : > { %v2303_v16 = vcombine.high %v4138_v53, %v4202_v34  ;;  %v2299_v43 = vcombine.high %v4141_v25, %v4205_v41  ;;  %v2304_v18 = vcombine.low %v4119_v6, %v4183_v40  ;;  %v2300_v13 = vcombine.low %v4116_v29, %v4180_v31 }
 0x4ff   : > { %v4228_v8 = vrot.slane %v2130_v52, %v4107_v60  ;;  %v2145_v63 = vrot.slane %v2131_v12, %v4107_v60  ;;  %v4232_v17 = vrot.slane %v2146_v28, %v4107_v60  ;;  %v2161_v5 = vrot.slane %v2147_v47, %v4107_v60 }
 0x500   : > { %2503 = vrot.lane.b32.xlu1 %v2303_v16, %s3289_s28  ;;  %2491 = vrot.lane.b32.xlu0 %v2299_v43, %s3289_s28  ;;  %v2305_v32 = vcombine.high %v4119_v6, %v4183_v40  ;;  %v2301_v50 = vcombine.high %v4116_v29, %v4180_v31  ;;  %v2031_v2 = vcombine.high %v4130_v38, %v4194_v42 }
 0x501   : > { %v2027_v7 = vcombine.high %v4124_v46, %v4188_v27  ;;  %v2032_v60 = vcombine.low %v4133_v56, %v4197_v10  ;;  %v2028_v35 = vcombine.low %v4127_v39, %v4191_v36  ;;  %v2033_v58 = vcombine.high %v4133_v56, %v4197_v10 }
 0x502   : > { %v2029_v6 = vcombine.high %v4127_v39, %v4191_v36  ;;  %v2439_v29 = vcombine.high %v4150_v57, %v4214_v15  ;;  %v2435_v20 = vcombine.high %v4144_v4, %v4208_v23  ;;  %v2440_v48 = vcombine.low %v4153_v51, %v4217_v19 }
 0x503   : > { %v2436_v9 = vcombine.low %v4147_v26, %v4211_v33  ;;  %v2167_v49 = vcombine.high %v4162_v59, %v4232_v17  ;;  %v2163_v56 = vcombine.high %v4156_v3, %v4228_v8  ;;  %v2168_v39 = vcombine.low %v4165_v14, %v2161_v5 }
 0x504   : > { %2507 = vrot.lane.b32.xlu1 %v2304_v18, %s3286_s6  ;;  %2495 = vrot.lane.b32.xlu0 %v2300_v13, %s3286_s6  ;;  %v2164_v1 = vcombine.low %v4159_v22, %v2145_v63  ;;  %v2169_v55 = vcombine.high %v4165_v14, %v2161_v5  ;;  %v2165_v61 = vcombine.high %v4159_v22, %v2145_v63 }
 0x505   : > { %v2441_v30 = vcombine.high %v4153_v51, %v4217_v19  ;;  %v2437_v37 = vcombine.high %v4147_v26, %v4211_v33  ;;  %v2302_v31 = vcombine.low %v4138_v53, %v4202_v34  ;;  %v2298_v40 = vcombine.low %v4141_v25, %v4205_v41 }
 0x506   : > { %v2030_v24 = vcombine.low %v4130_v38, %v4194_v42  ;;  %v2026_v14 = vcombine.low %v4124_v46, %v4188_v27  ;;  %v2438_v22 = vcombine.low %v4150_v57, %v4214_v15  ;;  %v2434_v51 = vcombine.low %v4144_v4, %v4208_v23 }
 0x507   : > { %v2166_v26 = vcombine.low %v4162_v59, %v4232_v17  ;;  %v2162_v53 = vcombine.low %v4156_v3, %v4228_v8 }
 0x508   : > { %2511 = vrot.lane.b32.xlu1 %v2305_v32, %s3285_s5  ;;  %2499 = vrot.lane.b32.xlu0 %v2301_v50, %s3285_s5 }
 0x50c   : > { %2455 = vrot.lane.b32.xlu1 %v2031_v2, %s3289_s28  ;;  %2443 = vrot.lane.b32.xlu0 %v2027_v7, %s3289_s28 }
 0x510   : > { %2459 = vrot.lane.b32.xlu1 %v2032_v60, %s3286_s6  ;;  %2447 = vrot.lane.b32.xlu0 %v2028_v35, %s3286_s6 }
 0x514   : > { %2463 = vrot.lane.b32.xlu1 %v2033_v58, %s3285_s5  ;;  %2451 = vrot.lane.b32.xlu0 %v2029_v6, %s3285_s5 }
 0x518   : > { %2527 = vrot.lane.b32.xlu1 %v2439_v29, %s3289_s28  ;;  %2515 = vrot.lane.b32.xlu0 %v2435_v20, %s3289_s28 }
 0x51c   : > { %2531 = vrot.lane.b32.xlu1 %v2440_v48, %s3286_s6  ;;  %2519 = vrot.lane.b32.xlu0 %v2436_v9, %s3286_s6 }
 0x520   : > { %2479 = vrot.lane.b32.xlu1 %v2167_v49, %s3289_s28  ;;  %2467 = vrot.lane.b32.xlu0 %v2163_v56, %s3289_s28 }
 0x524   : > { %2483 = vrot.lane.b32.xlu1 %v2168_v39, %s3286_s6  ;;  %2471 = vrot.lane.b32.xlu0 %v2164_v1, %s3286_s6 }
 0x528   : > { %2487 = vrot.lane.b32.xlu1 %v2169_v55, %s3285_s5  ;;  %2475 = vrot.lane.b32.xlu0 %v2165_v61, %s3285_s5 }
 0x52c   : > { %2535 = vrot.lane.b32.xlu1 %v2441_v30, %s3285_s5  ;;  %2523 = vrot.lane.b32.xlu0 %v2437_v37, %s3285_s5 }
 0x572   : > { %v2504_v46 = vpop.permute.xlu1 %2503  ;;  %v2492_v38 = vpop.permute.xlu0 %2491 }
 0x573   : > { %v2555_v27 = vsel %vm460_vm0, %v2302_v31, %v2504_v46  ;;  %v2552_v36 = vsel %vm460_vm0, %v2298_v40, %v2492_v38 }
 0x576   : > { %v2508_v25 = vpop.permute.xlu1 %2507  ;;  %v2496_v45 = vpop.permute.xlu0 %2495 }
 0x577   : > { %v2556_v42 = vsel %vm2539_vm5, %v2555_v27, %v2508_v25  ;;  %v2553_v10 = vsel %vm2539_vm5, %v2552_v36, %v2496_v45 }
 0x57a   : > { %v2512_v11 = vpop.permute.xlu1 %2511  ;;  %v2500_v54 = vpop.permute.xlu0 %2499 }
 0x57b   : > { %v2557_v0 = vsel %vm2541_vm6, %v2556_v42, %v2512_v11  ;;  %v2554_v44 = vsel %vm2541_vm6, %v2553_v10, %v2500_v54 }
 0x57c   : > { %2569 = vst [vmem:[%s4318_s3 + $0x28] sm:$0xff] %v2557_v0  ;;  %2568 = vst [vmem:[%s4318_s3 + $0x20] sm:$0xff] %v2554_v44 }
 0x57e   : > { %v2456_v21 = vpop.permute.xlu1 %2455  ;;  %v2444_v62 = vpop.permute.xlu0 %2443 }
 0x57f   : > { %v2543_v33 = vsel %vm460_vm0, %v2030_v24, %v2456_v21  ;;  %v2538_v19 = vsel %vm460_vm0, %v2026_v14, %v2444_v62 }
 0x582   : > { %v2460_v34 = vpop.permute.xlu1 %2459  ;;  %v2448_v41 = vpop.permute.xlu0 %2447 }
 0x583   : > { %v2544_v52 = vsel %vm2539_vm5, %v2543_v33, %v2460_v34  ;;  %v2540_v12 = vsel %vm2539_vm5, %v2538_v19, %v2448_v41 }
 0x586   : > { %v2464_v28 = vpop.permute.xlu1 %2463  ;;  %v2452_v47 = vpop.permute.xlu0 %2451 }
 0x587   : > { %v2545_v16 = vsel %vm2541_vm6, %v2544_v52, %v2464_v28  ;;  %v2542_v43 = vsel %vm2541_vm6, %v2540_v12, %v2452_v47 }
 0x588   : > { %2565 = vst [vmem:[%s4318_s3 + $0x8] sm:$0xff] %v2545_v16  ;;  %2564 = vst [vmem:[%s4318_s3] sm:$0xff] %v2542_v43 }
 0x58a   : > { %v2528_v18 = vpop.permute.xlu1 %2527  ;;  %v2516_v13 = vpop.permute.xlu0 %2515 }
 0x58b   : > { %v2561_v3 = vsel %vm460_vm0, %v2438_v22, %v2528_v18  ;;  %v2558_v59 = vsel %vm460_vm0, %v2434_v51, %v2516_v13 }
 0x58e   : > { %v2532_v63 = vpop.permute.xlu1 %2531  ;;  %v2520_v5 = vpop.permute.xlu0 %2519 }
 0x58f   : > { %v2562_v8 = vsel %vm2539_vm5, %v2561_v3, %v2532_v63  ;;  %v2559_v17 = vsel %vm2539_vm5, %v2558_v59, %v2520_v5 }
 0x592   : > { %v2480_v32 = vpop.permute.xlu1 %2479  ;;  %v2468_v50 = vpop.permute.xlu0 %2467 }
 0x593   : > { %v2549_v60 = vsel %vm460_vm0, %v2166_v26, %v2480_v32  ;;  %v2546_v35 = vsel %vm460_vm0, %v2162_v53, %v2468_v50 }
 0x596   : > { %v2484_v2 = vpop.permute.xlu1 %2483  ;;  %v2472_v7 = vpop.permute.xlu0 %2471 }
 0x597   : > { %v2550_v58 = vsel %vm2539_vm5, %v2549_v60, %v2484_v2  ;;  %v2547_v6 = vsel %vm2539_vm5, %v2546_v35, %v2472_v7 }
 0x59a   : > { %v2488_v29 = vpop.permute.xlu1 %2487  ;;  %v2476_v20 = vpop.permute.xlu0 %2475 }
 0x59b   : > { %v2551_v48 = vsel %vm2541_vm6, %v2550_v58, %v2488_v29  ;;  %v2548_v9 = vsel %vm2541_vm6, %v2547_v6, %v2476_v20 }
 0x59c   : > { %2567 = vst [vmem:[%s4318_s3 + $0x18] sm:$0xff] %v2551_v48  ;;  %2566 = vst [vmem:[%s4318_s3 + $0x10] sm:$0xff] %v2548_v9 }
 0x59e   : > { %v2536_v49 = vpop.permute.xlu1 %2535  ;;  %v2524_v56 = vpop.permute.xlu0 %2523 }
 0x59f   : > { %v2563_v4 = vsel %vm2541_vm6, %v2562_v8, %v2536_v49  ;;  %v2560_v57 = vsel %vm2541_vm6, %v2559_v17, %v2524_v56 }
 0x5a0   : > { %2571 = vst [vmem:[%s4318_s3 + $0x38] sm:$0xff] %v2563_v4  ;;  %2570 = vst [vmem:[%s4318_s3 + $0x30] sm:$0xff] %v2560_v57 }
 0x5a1   : > { %3227 = shalt.err (!%p3224_p2)
}
 0x5a2   : > { %s3228_s27 = scalar_lea.hbm %s4359_s20, 1024  ;;  %s3232_s26 = scalar_lea.hbm %s4409_s2, 2048 }
 0x5a3   : > { %p3229_p4 = scmp.ne.s32.totalorder %s4359_s20, %s3228_s27  ;;  %p3233_p9 = scmp.lt.u32.totalorder %s4359_s20, %s4409_s2 }
 0x5a4   : > { %p3234_p1 = scmp.lt.u32.totalorder %s3232_s26, %s3228_s27  ;;  %p3236_p6 = scmp.lt.u32.totalorder %s3228_s27, %s4359_s20 }
 0x5a5   : > { %p3230_p5 = pnand %p3229_p4, %p4424_p11 }
 0x5a6   : > { %p3235_p3 = por %p3234_p1, %p3233_p9 }
 0x5a7   : > { %p3231_p7 = pneg %p3230_p5 }
 0x5a8   : > { %p3237_p12 = por %p3236_p6, %p3235_p3 }
 0x5aa   : > { %p3238_p13 = pnand %p3237_p12, %p3231_p7 }
 0x5ac   : > { %3241 = shalt.err (!%p3238_p13)
}
 0x5ad   : > { %2997 = dma.vmem_to_hbm [thread:$0]  (%p4424_p11), %s4361_s7, 1024, %s4359_s20, %s2573_s14  }
 0x5ae PF: > { %s2599_s6 = sand.u32 1, %s3268_s9   ;;  %p4425_p8 = scmp.ne.s32.totalorder %s4414_s22, 0 }
 0x5af   : > { %p4426_p10 = scmp.ge.s32.totalorder %s3280_s12, 2  ;;  %s2600_s28 = scalar_lea.sflag [#allocation4], %s2599_s6 }
 0x5b1   : > { %p3004_p0 = pnand %p4426_p10, %p4425_p8 }
 0x5b3   : > { %3263 = dma.done.wait (!%p3004_p0), %s2600_s28, 1024  }
 0x5b4   : > { %3265 = vsyncadd (!%p3004_p0), %s2600_s28, 4294966272  ;;  %p15_p2 = scmp.ge.s32.totalorder %s3331_s15, 4   ;;  %s4427_s9 = smov %s3272_s10 }
 0x5b5   : > { %s4428_s10 = smov %s3276_s11  ;;  %s4429_s11 = smov %s3343_s18 }
 0x5b6   : > { %s4430_s12 = smov %s3331_s15  ;;  %17 = sbr.rel (!%p15_p2) target bundleno = 5 (0x5), region = 73 }
 0x5bd   :  { %2605 = vsyncpa [#allocation3], 1 }
 0x5be   :  { %2607 = vsyncpa [#allocation3 + $0x1], 1 }
 0x5bf   :  { %2608 = vsyncpa [#allocation4], 1 }
 0x5c0   :  { %2610 = vsyncpa [#allocation4 + $0x1], 1 }

</bundles_post_ra>
